<compile_context>
chip_gen: v6e
topology: v6e:2x2x1
jax: 0.10.0
libtpu: 0.0.40
codegen_flags: <defaults>
</compile_context>

<pallas_src>
import functools

import jax
import jax.numpy as jnp
from jax import lax
from jax.experimental import pallas as pl
from jax.experimental.pallas import tpu as pltpu


# ----------------------------------------------------------------------------
# Kernel 1: time-parallel input projection ("gates_x") for both directions.
# ----------------------------------------------------------------------------
def _gates_x_kernel(x_ref, w_ref, b_ref, o_ref):
    """gates_x[d] = sum_p x_parts[p] @ W_ih[d, p] + b[d].

    x_ref : (P, M, F)     flattened (S*B, F) inputs; one part per previous direction
    w_ref : (1, P, F, G)  this direction's input->gate weights, G = 4H
    b_ref : (1, 1, G)     combined bias (b_ih + b_hh), folded in off the recurrence
    o_ref : (1, M, G)
    """
    P = x_ref.shape[0]
    acc = jnp.dot(x_ref[0], w_ref[0, 0], preferred_element_type=jnp.float32)
    for p in range(1, P):  # P is 1 (layer 0) or 2 (later layers); static unroll
        acc = acc + jnp.dot(x_ref[p], w_ref[0, p],
                            preferred_element_type=jnp.float32)
    o_ref[0] = acc + b_ref[0]


def gates_x(x_parts, w_ih, b):
    """x_parts: (P, M, F); w_ih: (2, P, F, 4H); b: (2, 1, 4H) -> (2, M, 4H)."""
    P, M, F = x_parts.shape
    G = w_ih.shape[-1]
    # NOTE: for large S*B this GEMM should be tiled over an M grid axis; full blocks
    # are fine at these sizes and give one MXU-friendly pass per direction.
    return pl.pallas_call(
        _gates_x_kernel,
        out_shape=jax.ShapeDtypeStruct((2, M, G), jnp.float32),
        grid_spec=pltpu.PrefetchScalarGridSpec(
            num_scalar_prefetch=0,
            grid=(2,),  # direction
            in_specs=[
                pl.BlockSpec((P, M, F), lambda d: (0, 0, 0)),
                pl.BlockSpec((1, P, F, G), lambda d: (d, 0, 0, 0)),
                pl.BlockSpec((1, 1, G), lambda d: (d, 0, 0)),
            ],
            out_specs=pl.BlockSpec((1, M, G), lambda d: (d, 0, 0)),
        ),
        compiler_params=pltpu.CompilerParams(
            dimension_semantics=("parallel",),  # directions independent
        ),
    )(x_parts, w_ih, b)


# ----------------------------------------------------------------------------
# Kernel 2: fused forward+backward LSTM recurrence, T_BLOCK timesteps per step.
# ----------------------------------------------------------------------------
def _lstm_bidir_kernel(gx_ref, whh_ref, out_ref, h_scr, c_scr):
    """grid = (direction, time-block).

    gx_ref  : (1, T, B, 4H)  precomputed x@W_ih + bias (block already time-reversed
                             for the backward direction by the index_map)
    whh_ref : (1, H, 4H)     hidden->gate weights for this direction
    out_ref : (1, T, B, H)   hidden outputs, written in ORIGINAL time order
    h_scr   : (B, H)         persistent hidden state (per direction / per core)
    c_scr   : (B, H)         persistent cell state
    """
    d = pl.program_id(0)      # 0 = forward, 1 = backward
    tb = pl.program_id(1)

    @pl.when(tb == 0)
    def _():
        h_scr[...] = jnp.zeros_like(h_scr)
        c_scr[...] = jnp.zeros_like(c_scr)

    whh = whh_ref[0]                      # (H, 4H), hoisted out of the step loop
    t_block = gx_ref.shape[1]
    H = h_scr.shape[-1]

    def step(k, carry):
        # Forward walks local index 0..T-1; backward walks T-1..0.  Combined with the
        # reversed block index_map the backward direction sees original time S-1..0,
        # while every hidden state is stored back at its original time position.
        lt = k + d * (t_block - 1 - 2 * k)
        gates = gx_ref[0, lt] + jnp.dot(
            h_scr[...], whh, preferred_element_type=jnp.float32)    # (B, 4H)
        # PyTorch gate order: input, forget, cell(g), output.
        i = jax.nn.sigmoid(gates[:, 0 * H:1 * H])
        f = jax.nn.sigmoid(gates[:, 1 * H:2 * H])
        g = jnp.tanh(gates[:, 2 * H:3 * H])
        o = jax.nn.sigmoid(gates[:, 3 * H:4 * H])
        c = f * c_scr[...] + i * g
        h = o * jnp.tanh(c)
        c_scr[...] = c
        h_scr[...] = h
        out_ref[0, lt] = h.astype(out_ref.dtype)
        return carry

    lax.fori_loop(0, t_block, step, 0, unroll=True)


def lstm_bidir(gx, whh, t_block):
    """gx: (2, S, B, 4H); whh: (2, H, 4H) -> hidden outputs (2, S, B, H)."""
    D, S, B, G = gx.shape
    H = whh.shape[1]
    n_tb = S // t_block

    def time_map(d, t):
        # forward: block t ; backward: block n_tb-1-t (reversal in the DMA, no copies)
        return t + d * (n_tb - 1 - 2 * t)

    return pl.pallas_call(
        _lstm_bidir_kernel,
        out_shape=jax.ShapeDtypeStruct((D, S, B, H), jnp.float32),
        grid_spec=pltpu.PrefetchScalarGridSpec(
            num_scalar_prefetch=0,
            grid=(D, n_tb),
            in_specs=[
                pl.BlockSpec((1, t_block, B, G),
                             lambda d, t: (d, time_map(d, t), 0, 0)),
                pl.BlockSpec((1, H, G), lambda d, t: (d, 0, 0)),
            ],
            out_specs=pl.BlockSpec((1, t_block, B, H),
                                   lambda d, t: (d, time_map(d, t), 0, 0)),
            scratch_shapes=[
                pltpu.VMEM((B, H), jnp.float32),  # h
                pltpu.VMEM((B, H), jnp.float32),  # c
            ],
        ),
        compiler_params=pltpu.CompilerParams(
            # direction axis is independent (-> both TensorCores on v7x);
            # the time axis carries the recurrence and must stay sequential.
            dimension_semantics=("parallel", "arbitrary"),
        ),
    )(gx, whh)


# ----------------------------------------------------------------------------
# Model: embedding -> n_layers bidirectional LSTM -> concat final hiddens -> fc
# ----------------------------------------------------------------------------
def _pick_t_block(S, max_t_block=16):
    """Largest divisor of S that is <= max_t_block (amortizes ~0.35us/grid-step)."""
    tb = min(S, max_t_block)
    while S % tb:
        tb -= 1
    return tb


def rnn_forward(text, params, n_layers, hidden_dim):
    S, B = text.shape
    H = hidden_dim

    # Embedding gather + dropout (identity, eval) kept as XLA glue.
    emb = params["embedding"][text]                       # (S, B, E)

    # Pad batch to a multiple of 8 so every tile's sublane axis is full.
    Bp = ((B + 7) // 8) * 8
    if Bp != B:
        emb = jnp.pad(emb, ((0, 0), (0, Bp - B), (0, 0)))

    t_block = _pick_t_block(S)

    x_parts = emb.reshape(1, S * Bp, emb.shape[-1])       # (P=1, S*Bp, E)
    out = None
    for layer in range(n_layers):
        gx = gates_x(x_parts, params[f"l{layer}_wih"], params[f"l{layer}_b"])
        gx = gx.reshape(2, S, Bp, 4 * H)                  # (2, S, B, 4H)
        out = lstm_bidir(gx, params[f"l{layer}_whh"], t_block)   # (2, S, B, H)
        # Next layer consumes the two direction slabs as separate parts -> no
        # (S, B, 2H) concat copy between layers.
        x_parts = out.reshape(2, S * Bp, H)

    # hidden[-2] = last-layer forward final state (t = S-1),
    # hidden[-1] = last-layer backward final state (t = 0 in original time).
    h_fwd = out[0, S - 1, :B]
    h_bwd = out[1, 0, :B]
    hidden = jnp.concatenate([h_fwd, h_bwd], axis=1)      # (B, 2H)

    # dropout -> identity (eval).  Tiny classifier head left to XLA (per review).
    return jnp.dot(hidden, params["fc_w"],
                   precision=lax.Precision.HIGHEST) + params["fc_b"]


def init_params(key, vocab_size, embedding_dim, hidden_dim, output_dim, n_layers):
    params = {}
    scale = 0.1

    def nrm(k, shape):
        return scale * jax.random.normal(k, shape, dtype=jnp.float32)

    key, k = jax.random.split(key)
    params["embedding"] = nrm(k, (vocab_size, embedding_dim))

    H = hidden_dim
    for layer in range(n_layers):
        # layer 0 input = embedding (1 part); later layers = 2 direction parts of size H.
        parts, feat = (1, embedding_dim) if layer == 0 else (2, H)
        key, k1, k2, k3 = jax.random.split(key, 4)
        # NOTE: layout is (in, 4H) -- transposed vs PyTorch's (4H, in); real PyTorch
        # checkpoints must be transposed (and split into parts) on load.
        params[f"l{layer}_wih"] = nrm(k1, (2, parts, feat, 4 * H))
        params[f"l{layer}_whh"] = nrm(k2, (2, H, 4 * H))
        params[f"l{layer}_b"] = nrm(k3, (2, 1, 4 * H))   # combined b_ih + b_hh

    key, k1, k2 = jax.random.split(key, 3)
    params["fc_w"] = nrm(k1, (2 * H, output_dim))
    params["fc_b"] = nrm(k2, (output_dim,))
    return params


# ----------------------------------------------------------------------------
# Pure-JAX reference (lax.scan) with the exact PyTorch LSTM semantics.
# ----------------------------------------------------------------------------
def rnn_forward_reference(text, params, n_layers, hidden_dim):
    H = hidden_dim
    hp = lax.Precision.HIGHEST
    x = params["embedding"][text]                         # (S, B, E)
    B = x.shape[1]
    finals = None
    for layer in range(n_layers):
        wih = params[f"l{layer}_wih"]                     # (2, P, F, 4H)
        whh = params[f"l{layer}_whh"]
        b = params[f"l{layer}_b"]
        wih_cat = wih.reshape(2, -1, 4 * H)               # parts stacked along rows
        outs, finals = [], []
        for d in range(2):
            xs = x if d == 0 else x[::-1]

            def step(carry, x_t, d=d):
                h, c = carry
                gates = (jnp.dot(x_t, wih_cat[d], precision=hp)
                         + jnp.dot(h, whh[d], precision=hp) + b[d, 0])
                i = jax.nn.sigmoid(gates[:, 0 * H:1 * H])
                f = jax.nn.sigmoid(gates[:, 1 * H:2 * H])
                g = jnp.tanh(gates[:, 2 * H:3 * H])
                o = jax.nn.sigmoid(gates[:, 3 * H:4 * H])
                c = f * c + i * g
                h = o * jnp.tanh(c)
                return (h, c), h

            init = (jnp.zeros((B, H), jnp.float32), jnp.zeros((B, H), jnp.float32))
            (h_T, _), ys = lax.scan(step, init, xs)
            outs.append(ys if d == 0 else ys[::-1])
            finals.append(h_T)
        x = jnp.concatenate(outs, axis=-1)                # (S, B, 2H)
    hidden = jnp.concatenate(finals, axis=1)
    return jnp.dot(hidden, params["fc_w"], precision=hp) + params["fc_b"]


if __name__ == "__main__":
    # Small shapes consistent with the module.
    vocab_size = 50
    embedding_dim = 32
    hidden_dim = 32
    output_dim = 2
    n_layers = 2
    seq_len = 8
    batch = 4
    # bidirectional=True, dropout=0.0 (eval mode -> identity)

    key = jax.random.PRNGKey(0)
    key, pkey, tkey = jax.random.split(key, 3)
    params = init_params(pkey, vocab_size, embedding_dim, hidden_dim,
                         output_dim, n_layers)
    text = jax.random.randint(tkey, (seq_len, batch), 0, vocab_size,
                              dtype=jnp.int32)

    fwd = jax.jit(functools.partial(rnn_forward, n_layers=n_layers,
                                    hidden_dim=hidden_dim))
    out = fwd(text, params)
    jax.block_until_ready(out)

    assert out.shape == (batch, output_dim), out.shape
    assert out.dtype == jnp.float32

    # Correctness check vs. pure-JAX reference (tolerance covers MXU/EUP rounding).
    ref = rnn_forward_reference(text, params, n_layers, hidden_dim)
    assert jnp.allclose(out, ref, atol=5e-3, rtol=5e-3), (out, ref)

    print("KERNEL_OK")
</pallas_src>

<mosaic_0001>
module attributes {stable_mosaic.version = 11 : i64} {
  func.func @_gates_x_kernel(%arg0: i32, %arg1: memref<1x64x32xf32, #tpu.memory_space<vmem>>, %arg2: memref<1x1x32x128xf32, #tpu.memory_space<vmem>>, %arg3: memref<1x1x128xf32, #tpu.memory_space<vmem>>, %arg4: memref<1x64x128xf32, #tpu.memory_space<vmem>>) attributes {dimension_semantics = [#tpu.dimension_semantics<parallel>], iteration_bounds = array<i64: 2>, scalar_prefetch = 0 : i64, scratch_operands = 0 : i64, tpu.core_type = #tpu.core_type<tc>, window_params = [{pipeline_mode = #tpu.pipeline_mode<synchronous>, transform_indices = @transform_0, window_bounds = array<i64: 1, 64, 32>}, {transform_indices = @transform_1, window_bounds = array<i64: 1, 1, 32, 128>}, {transform_indices = @transform_2, window_bounds = array<i64: 1, 1, 128>}, {transform_indices = @transform_3, window_bounds = array<i64: 1, 64, 128>}]} {
    %c0 = arith.constant 0 : index
    %c0_0 = arith.constant 0 : index
    %c0_1 = arith.constant 0 : index
    %0 = vector.load %arg1[%c0, %c0_0, %c0_1] : memref<1x64x32xf32, #tpu.memory_space<vmem>>, vector<1x64x32xf32>
    %1 = vector.shape_cast %0 : vector<1x64x32xf32> to vector<64x32xf32>
    %c0_2 = arith.constant 0 : index
    %c0_3 = arith.constant 0 : index
    %c0_4 = arith.constant 0 : index
    %c0_5 = arith.constant 0 : index
    %2 = vector.load %arg2[%c0_2, %c0_3, %c0_4, %c0_5] : memref<1x1x32x128xf32, #tpu.memory_space<vmem>>, vector<1x1x32x128xf32>
    %3 = vector.shape_cast %2 : vector<1x1x32x128xf32> to vector<32x128xf32>
    %cst = arith.constant dense<0.000000e+00> : vector<64x128xf32>
    %4 = tpu.matmul %1, %3, %cst {dimension_numbers = #tpu.dot_dimension_numbers<[1], [0], [0], [1], [0, 0, 1, 1], [], []>} : vector<64x32xf32>, vector<32x128xf32>, vector<64x128xf32> -> vector<64x128xf32>
    %c0_6 = arith.constant 0 : index
    %c0_7 = arith.constant 0 : index
    %c0_8 = arith.constant 0 : index
    %5 = vector.load %arg3[%c0_6, %c0_7, %c0_8] : memref<1x1x128xf32, #tpu.memory_space<vmem>>, vector<1x1x128xf32>
    %6 = vector.shape_cast %5 : vector<1x1x128xf32> to vector<1x128xf32>
    %7 = vector.broadcast %6 : vector<1x128xf32> to vector<64x128xf32>
    %8 = arith.addf %4, %7 : vector<64x128xf32>
    %c0_9 = arith.constant 0 : index
    %c0_10 = arith.constant 0 : index
    %c0_11 = arith.constant 0 : index
    %9 = vector.load %arg4[%c0_9, %c0_10, %c0_11] : memref<1x64x128xf32, #tpu.memory_space<vmem>>, vector<1x64x128xf32>
    %10 = vector.shape_cast %9 : vector<1x64x128xf32> to vector<64x128xf32>
    %11 = vector.shape_cast %8 : vector<64x128xf32> to vector<1x64x128xf32>
    tpu.vector_store %arg4[%c0_9, %c0_10, %c0_11], %11 {strides = array<i32>} : memref<1x64x128xf32, #tpu.memory_space<vmem>>, vector<1x64x128xf32>,
    return
  }
  func.func @transform_0(%arg0: i32) -> (i32, i32, i32) {
    %c0_i32 = arith.constant 0 : i32
    %c0_i32_0 = arith.constant 0 : i32
    %c0_i32_1 = arith.constant 0 : i32
    %c0_i32_2 = arith.constant 0 : i32
    return %c0_i32, %c0_i32_0, %c0_i32_1 : i32, i32, i32
  }
  func.func @transform_1(%arg0: i32) -> (i32, i32, i32, i32) {
    %c0_i32 = arith.constant 0 : i32
    %c0_i32_0 = arith.constant 0 : i32
    %c0_i32_1 = arith.constant 0 : i32
    %c0_i32_2 = arith.constant 0 : i32
    return %arg0, %c0_i32, %c0_i32_0, %c0_i32_1 : i32, i32, i32, i32
  }
  func.func @transform_2(%arg0: i32) -> (i32, i32, i32) {
    %c0_i32 = arith.constant 0 : i32
    %c0_i32_0 = arith.constant 0 : i32
    %c0_i32_1 = arith.constant 0 : i32
    return %arg0, %c0_i32, %c0_i32_0 : i32, i32, i32
  }
  func.func @transform_3(%arg0: i32) -> (i32, i32, i32) {
    %c0_i32 = arith.constant 0 : i32
    %c0_i32_0 = arith.constant 0 : i32
    %c0_i32_1 = arith.constant 0 : i32
    return %arg0, %c0_i32, %c0_i32_0 : i32, i32, i32
  }
}

module attributes {stable_mosaic.version = 11 : i64} {
  func.func @_gates_x_kernel(%arg0: i32, %arg1: memref<2x64x32xf32, #tpu.memory_space<vmem>>, %arg2: memref<1x2x32x128xf32, #tpu.memory_space<vmem>>, %arg3: memref<1x1x128xf32, #tpu.memory_space<vmem>>, %arg4: memref<1x64x128xf32, #tpu.memory_space<vmem>>) attributes {dimension_semantics = [#tpu.dimension_semantics<parallel>], iteration_bounds = array<i64: 2>, scalar_prefetch = 0 : i64, scratch_operands = 0 : i64, tpu.core_type = #tpu.core_type<tc>, window_params = [{pipeline_mode = #tpu.pipeline_mode<synchronous>, transform_indices = @transform_0, window_bounds = array<i64: 2, 64, 32>}, {transform_indices = @transform_1, window_bounds = array<i64: 1, 2, 32, 128>}, {transform_indices = @transform_2, window_bounds = array<i64: 1, 1, 128>}, {transform_indices = @transform_3, window_bounds = array<i64: 1, 64, 128>}]} {
    %c0 = arith.constant 0 : index
    %c0_0 = arith.constant 0 : index
    %c0_1 = arith.constant 0 : index
    %0 = vector.load %arg1[%c0, %c0_0, %c0_1] : memref<2x64x32xf32, #tpu.memory_space<vmem>>, vector<1x64x32xf32>
    %1 = vector.shape_cast %0 : vector<1x64x32xf32> to vector<64x32xf32>
    %c0_2 = arith.constant 0 : index
    %c0_3 = arith.constant 0 : index
    %c0_4 = arith.constant 0 : index
    %c0_5 = arith.constant 0 : index
    %2 = vector.load %arg2[%c0_2, %c0_3, %c0_4, %c0_5] : memref<1x2x32x128xf32, #tpu.memory_space<vmem>>, vector<1x1x32x128xf32>
    %3 = vector.shape_cast %2 : vector<1x1x32x128xf32> to vector<32x128xf32>
    %cst = arith.constant dense<0.000000e+00> : vector<64x128xf32>
    %4 = tpu.matmul %1, %3, %cst {dimension_numbers = #tpu.dot_dimension_numbers<[1], [0], [0], [1], [0, 0, 1, 1], [], []>} : vector<64x32xf32>, vector<32x128xf32>, vector<64x128xf32> -> vector<64x128xf32>
    %c1 = arith.constant 1 : index
    %c0_6 = arith.constant 0 : index
    %c0_7 = arith.constant 0 : index
    %5 = vector.load %arg1[%c1, %c0_6, %c0_7] : memref<2x64x32xf32, #tpu.memory_space<vmem>>, vector<1x64x32xf32>
    %6 = vector.shape_cast %5 : vector<1x64x32xf32> to vector<64x32xf32>
    %c0_8 = arith.constant 0 : index
    %c1_9 = arith.constant 1 : index
    %c0_10 = arith.constant 0 : index
    %c0_11 = arith.constant 0 : index
    %7 = vector.load %arg2[%c0_8, %c1_9, %c0_10, %c0_11] : memref<1x2x32x128xf32, #tpu.memory_space<vmem>>, vector<1x1x32x128xf32>
    %8 = vector.shape_cast %7 : vector<1x1x32x128xf32> to vector<32x128xf32>
    %cst_12 = arith.constant dense<0.000000e+00> : vector<64x128xf32>
    %9 = tpu.matmul %6, %8, %cst_12 {dimension_numbers = #tpu.dot_dimension_numbers<[1], [0], [0], [1], [0, 0, 1, 1], [], []>} : vector<64x32xf32>, vector<32x128xf32>, vector<64x128xf32> -> vector<64x128xf32>
    %10 = arith.addf %4, %9 : vector<64x128xf32>
    %c0_13 = arith.constant 0 : index
    %c0_14 = arith.constant 0 : index
    %c0_15 = arith.constant 0 : index
    %11 = vector.load %arg3[%c0_13, %c0_14, %c0_15] : memref<1x1x128xf32, #tpu.memory_space<vmem>>, vector<1x1x128xf32>
    %12 = vector.shape_cast %11 : vector<1x1x128xf32> to vector<1x128xf32>
    %13 = vector.broadcast %12 : vector<1x128xf32> to vector<64x128xf32>
    %14 = arith.addf %10, %13 : vector<64x128xf32>
    %c0_16 = arith.constant 0 : index
    %c0_17 = arith.constant 0 : index
    %c0_18 = arith.constant 0 : index
    %15 = vector.load %arg4[%c0_16, %c0_17, %c0_18] : memref<1x64x128xf32, #tpu.memory_space<vmem>>, vector<1x64x128xf32>
    %16 = vector.shape_cast %15 : vector<1x64x128xf32> to vector<64x128xf32>
    %17 = vector.shape_cast %14 : vector<64x128xf32> to vector<1x64x128xf32>
    tpu.vector_store %arg4[%c0_16, %c0_17, %c0_18], %17 {strides = array<i32>} : memref<1x64x128xf32, #tpu.memory_space<vmem>>, vector<1x64x128xf32>,
    return
  }
  func.func @transform_0(%arg0: i32) -> (i32, i32, i32) {
    %c0_i32 = arith.constant 0 : i32
    %c0_i32_0 = arith.constant 0 : i32
    %c0_i32_1 = arith.constant 0 : i32
    %c0_i32_2 = arith.constant 0 : i32
    return %c0_i32, %c0_i32_0, %c0_i32_1 : i32, i32, i32
  }
  func.func @transform_1(%arg0: i32) -> (i32, i32, i32, i32) {
    %c0_i32 = arith.constant 0 : i32
    %c0_i32_0 = arith.constant 0 : i32
    %c0_i32_1 = arith.constant 0 : i32
    %c0_i32_2 = arith.constant 0 : i32
    return %arg0, %c0_i32, %c0_i32_0, %c0_i32_1 : i32, i32, i32, i32
  }
  func.func @transform_2(%arg0: i32) -> (i32, i32, i32) {
    %c0_i32 = arith.constant 0 : i32
    %c0_i32_0 = arith.constant 0 : i32
    %c0_i32_1 = arith.constant 0 : i32
    return %arg0, %c0_i32, %c0_i32_0 : i32, i32, i32
  }
  func.func @transform_3(%arg0: i32) -> (i32, i32, i32) {
    %c0_i32 = arith.constant 0 : i32
    %c0_i32_0 = arith.constant 0 : i32
    %c0_i32_1 = arith.constant 0 : i32
    return %arg0, %c0_i32, %c0_i32_0 : i32, i32, i32
  }
}

module attributes {stable_mosaic.version = 11 : i64} {
  func.func @_lstm_bidir_kernel(%arg0: i32, %arg1: i32, %arg2: memref<1x8x8x128xf32, #tpu.memory_space<vmem>>, %arg3: memref<1x32x128xf32, #tpu.memory_space<vmem>>, %arg4: memref<1x8x8x32xf32, #tpu.memory_space<vmem>>, %arg5: memref<8x32xf32, #tpu.memory_space<vmem>>, %arg6: memref<8x32xf32, #tpu.memory_space<vmem>>) attributes {dimension_semantics = [#tpu.dimension_semantics<parallel>, #tpu.dimension_semantics<arbitrary>], iteration_bounds = array<i64: 2, 1>, scalar_prefetch = 0 : i64, scratch_operands = 2 : i64, tpu.core_type = #tpu.core_type<tc>, window_params = [{transform_indices = @transform_0, window_bounds = array<i64: 1, 8, 8, 128>}, {transform_indices = @transform_1, window_bounds = array<i64: 1, 32, 128>}, {transform_indices = @transform_2, window_bounds = array<i64: 1, 8, 8, 32>}]} {
    %c0_i32 = arith.constant 0 : i32
    %0 = arith.cmpi eq, %arg1, %c0_i32 : i32
    %1 = arith.extui %0 : i1 to i32
    %c0_i32_0 = arith.constant 0 : i32
    %2 = arith.cmpi ne, %1, %c0_i32_0 : i32
    scf.if %2 {
      %cst_163 = arith.constant 0.000000e+00 : f32
      %341 = vector.broadcast %cst_163 : f32 to vector<8x32xf32>
      %c0_164 = arith.constant 0 : index
      %c0_165 = arith.constant 0 : index
      %342 = vector.load %arg5[%c0_164, %c0_165] : memref<8x32xf32, #tpu.memory_space<vmem>>, vector<8x32xf32>
      tpu.vector_store %arg5[%c0_164, %c0_165], %341 {strides = array<i32>} : memref<8x32xf32, #tpu.memory_space<vmem>>, vector<8x32xf32>,
      %cst_166 = arith.constant 0.000000e+00 : f32
      %343 = vector.broadcast %cst_166 : f32 to vector<8x32xf32>
      %c0_167 = arith.constant 0 : index
      %c0_168 = arith.constant 0 : index
      %344 = vector.load %arg6[%c0_167, %c0_168] : memref<8x32xf32, #tpu.memory_space<vmem>>, vector<8x32xf32>
      tpu.vector_store %arg6[%c0_167, %c0_168], %343 {strides = array<i32>} : memref<8x32xf32, #tpu.memory_space<vmem>>, vector<8x32xf32>,
    } else {
    }
    %c0 = arith.constant 0 : index
    %c0_1 = arith.constant 0 : index
    %c0_2 = arith.constant 0 : index
    %3 = vector.load %arg3[%c0, %c0_1, %c0_2] : memref<1x32x128xf32, #tpu.memory_space<vmem>>, vector<1x32x128xf32>
    %4 = vector.shape_cast %3 : vector<1x32x128xf32> to vector<32x128xf32>
    %c0_i32_3 = arith.constant 0 : i32
    %c2_i32 = arith.constant 2 : i32
    %5 = arith.muli %c2_i32, %c0_i32_3 : i32
    %c7_i32 = arith.constant 7 : i32
    %6 = arith.subi %c7_i32, %5 : i32
    %7 = arith.muli %arg0, %6 : i32
    %8 = arith.addi %c0_i32_3, %7 : i32
    %c0_4 = arith.constant 0 : index
    %9 = arith.index_cast %8 : i32 to index
    %c0_5 = arith.constant 0 : index
    %c0_6 = arith.constant 0 : index
    %10 = vector.load %arg2[%c0_4, %9, %c0_5, %c0_6] : memref<1x8x8x128xf32, #tpu.memory_space<vmem>>, vector<1x1x8x128xf32>
    %11 = vector.shape_cast %10 : vector<1x1x8x128xf32> to vector<8x128xf32>
    %c0_7 = arith.constant 0 : index
    %c0_8 = arith.constant 0 : index
    %12 = vector.load %arg5[%c0_7, %c0_8] : memref<8x32xf32, #tpu.memory_space<vmem>>, vector<8x32xf32>
    %cst = arith.constant dense<0.000000e+00> : vector<8x128xf32>
    %13 = tpu.matmul %12, %4, %cst {dimension_numbers = #tpu.dot_dimension_numbers<[1], [0], [0], [1], [0, 0, 1, 1], [], []>} : vector<8x32xf32>, vector<32x128xf32>, vector<8x128xf32> -> vector<8x128xf32>
    %14 = arith.addf %11, %13 : vector<8x128xf32>
    %15 = vector.extract_strided_slice %14 {offsets = [0, 0], sizes = [8, 32], strides = [1, 1]} : vector<8x128xf32> to vector<8x32xf32>
    %16 = arith.negf %15 : vector<8x32xf32>
    %17 = math.exp %16 : vector<8x32xf32>
    %cst_9 = arith.constant 1.000000e+00 : f32
    %18 = vector.broadcast %cst_9 : f32 to vector<8x32xf32>
    %19 = arith.addf %18, %17 : vector<8x32xf32>
    %20 = arith.divf %18, %19 : vector<8x32xf32>
    %21 = vector.extract_strided_slice %14 {offsets = [0, 32], sizes = [8, 32], strides = [1, 1]} : vector<8x128xf32> to vector<8x32xf32>
    %22 = arith.negf %21 : vector<8x32xf32>
    %23 = math.exp %22 : vector<8x32xf32>
    %cst_10 = arith.constant 1.000000e+00 : f32
    %24 = vector.broadcast %cst_10 : f32 to vector<8x32xf32>
    %25 = arith.addf %24, %23 : vector<8x32xf32>
    %26 = arith.divf %24, %25 : vector<8x32xf32>
    %27 = vector.extract_strided_slice %14 {offsets = [0, 64], sizes = [8, 32], strides = [1, 1]} : vector<8x128xf32> to vector<8x32xf32>
    %28 = math.tanh %27 : vector<8x32xf32>
    %29 = vector.extract_strided_slice %14 {offsets = [0, 96], sizes = [8, 32], strides = [1, 1]} : vector<8x128xf32> to vector<8x32xf32>
    %30 = arith.negf %29 : vector<8x32xf32>
    %31 = math.exp %30 : vector<8x32xf32>
    %cst_11 = arith.constant 1.000000e+00 : f32
    %32 = vector.broadcast %cst_11 : f32 to vector<8x32xf32>
    %33 = arith.addf %32, %31 : vector<8x32xf32>
    %34 = arith.divf %32, %33 : vector<8x32xf32>
    %c0_12 = arith.constant 0 : index
    %c0_13 = arith.constant 0 : index
    %35 = vector.load %arg6[%c0_12, %c0_13] : memref<8x32xf32, #tpu.memory_space<vmem>>, vector<8x32xf32>
    %36 = arith.mulf %26, %35 : vector<8x32xf32>
    %37 = arith.mulf %20, %28 : vector<8x32xf32>
    %38 = arith.addf %36, %37 : vector<8x32xf32>
    %39 = math.tanh %38 : vector<8x32xf32>
    %40 = arith.mulf %34, %39 : vector<8x32xf32>
    %c0_14 = arith.constant 0 : index
    %c0_15 = arith.constant 0 : index
    %41 = vector.load %arg6[%c0_14, %c0_15] : memref<8x32xf32, #tpu.memory_space<vmem>>, vector<8x32xf32>
    tpu.vector_store %arg6[%c0_14, %c0_15], %38 {strides = array<i32>} : memref<8x32xf32, #tpu.memory_space<vmem>>, vector<8x32xf32>,
    %c0_16 = arith.constant 0 : index
    %c0_17 = arith.constant 0 : index
    %42 = vector.load %arg5[%c0_16, %c0_17] : memref<8x32xf32, #tpu.memory_space<vmem>>, vector<8x32xf32>
    tpu.vector_store %arg5[%c0_16, %c0_17], %40 {strides = array<i32>} : memref<8x32xf32, #tpu.memory_space<vmem>>, vector<8x32xf32>,
    %c0_18 = arith.constant 0 : index
    %43 = arith.index_cast %8 : i32 to index
    %c0_19 = arith.constant 0 : index
    %c0_20 = arith.constant 0 : index
    %44 = vector.load %arg4[%c0_18, %43, %c0_19, %c0_20] : memref<1x8x8x32xf32, #tpu.memory_space<vmem>>, vector<1x1x8x32xf32>
    %45 = vector.shape_cast %44 : vector<1x1x8x32xf32> to vector<8x32xf32>
    %46 = vector.shape_cast %40 : vector<8x32xf32> to vector<1x1x8x32xf32>
    tpu.vector_store %arg4[%c0_18, %43, %c0_19, %c0_20], %46 {strides = array<i32>} : memref<1x8x8x32xf32, #tpu.memory_space<vmem>>, vector<1x1x8x32xf32>,
    %c1_i32 = arith.constant 1 : i32
    %c2_i32_21 = arith.constant 2 : i32
    %47 = arith.muli %c2_i32_21, %c1_i32 : i32
    %c7_i32_22 = arith.constant 7 : i32
    %48 = arith.subi %c7_i32_22, %47 : i32
    %49 = arith.muli %arg0, %48 : i32
    %50 = arith.addi %c1_i32, %49 : i32
    %c0_23 = arith.constant 0 : index
    %51 = arith.index_cast %50 : i32 to index
    %c0_24 = arith.constant 0 : index
    %c0_25 = arith.constant 0 : index
    %52 = vector.load %arg2[%c0_23, %51, %c0_24, %c0_25] : memref<1x8x8x128xf32, #tpu.memory_space<vmem>>, vector<1x1x8x128xf32>
    %53 = vector.shape_cast %52 : vector<1x1x8x128xf32> to vector<8x128xf32>
    %c0_26 = arith.constant 0 : index
    %c0_27 = arith.constant 0 : index
    %54 = vector.load %arg5[%c0_26, %c0_27] : memref<8x32xf32, #tpu.memory_space<vmem>>, vector<8x32xf32>
    %cst_28 = arith.constant dense<0.000000e+00> : vector<8x128xf32>
    %55 = tpu.matmul %54, %4, %cst_28 {dimension_numbers = #tpu.dot_dimension_numbers<[1], [0], [0], [1], [0, 0, 1, 1], [], []>} : vector<8x32xf32>, vector<32x128xf32>, vector<8x128xf32> -> vector<8x128xf32>
    %56 = arith.addf %53, %55 : vector<8x128xf32>
    %57 = vector.extract_strided_slice %56 {offsets = [0, 0], sizes = [8, 32], strides = [1, 1]} : vector<8x128xf32> to vector<8x32xf32>
    %58 = arith.negf %57 : vector<8x32xf32>
    %59 = math.exp %58 : vector<8x32xf32>
    %cst_29 = arith.constant 1.000000e+00 : f32
    %60 = vector.broadcast %cst_29 : f32 to vector<8x32xf32>
    %61 = arith.addf %60, %59 : vector<8x32xf32>
    %62 = arith.divf %60, %61 : vector<8x32xf32>
    %63 = vector.extract_strided_slice %56 {offsets = [0, 32], sizes = [8, 32], strides = [1, 1]} : vector<8x128xf32> to vector<8x32xf32>
    %64 = arith.negf %63 : vector<8x32xf32>
    %65 = math.exp %64 : vector<8x32xf32>
    %cst_30 = arith.constant 1.000000e+00 : f32
    %66 = vector.broadcast %cst_30 : f32 to vector<8x32xf32>
    %67 = arith.addf %66, %65 : vector<8x32xf32>
    %68 = arith.divf %66, %67 : vector<8x32xf32>
    %69 = vector.extract_strided_slice %56 {offsets = [0, 64], sizes = [8, 32], strides = [1, 1]} : vector<8x128xf32> to vector<8x32xf32>
    %70 = math.tanh %69 : vector<8x32xf32>
    %71 = vector.extract_strided_slice %56 {offsets = [0, 96], sizes = [8, 32], strides = [1, 1]} : vector<8x128xf32> to vector<8x32xf32>
    %72 = arith.negf %71 : vector<8x32xf32>
    %73 = math.exp %72 : vector<8x32xf32>
    %cst_31 = arith.constant 1.000000e+00 : f32
    %74 = vector.broadcast %cst_31 : f32 to vector<8x32xf32>
    %75 = arith.addf %74, %73 : vector<8x32xf32>
    %76 = arith.divf %74, %75 : vector<8x32xf32>
    %c0_32 = arith.constant 0 : index
    %c0_33 = arith.constant 0 : index
    %77 = vector.load %arg6[%c0_32, %c0_33] : memref<8x32xf32, #tpu.memory_space<vmem>>, vector<8x32xf32>
    %78 = arith.mulf %68, %77 : vector<8x32xf32>
    %79 = arith.mulf %62, %70 : vector<8x32xf32>
    %80 = arith.addf %78, %79 : vector<8x32xf32>
    %81 = math.tanh %80 : vector<8x32xf32>
    %82 = arith.mulf %76, %81 : vector<8x32xf32>
    %c0_34 = arith.constant 0 : index
    %c0_35 = arith.constant 0 : index
    %83 = vector.load %arg6[%c0_34, %c0_35] : memref<8x32xf32, #tpu.memory_space<vmem>>, vector<8x32xf32>
    tpu.vector_store %arg6[%c0_34, %c0_35], %80 {strides = array<i32>} : memref<8x32xf32, #tpu.memory_space<vmem>>, vector<8x32xf32>,
    %c0_36 = arith.constant 0 : index
    %c0_37 = arith.constant 0 : index
    %84 = vector.load %arg5[%c0_36, %c0_37] : memref<8x32xf32, #tpu.memory_space<vmem>>, vector<8x32xf32>
    tpu.vector_store %arg5[%c0_36, %c0_37], %82 {strides = array<i32>} : memref<8x32xf32, #tpu.memory_space<vmem>>, vector<8x32xf32>,
    %c0_38 = arith.constant 0 : index
    %85 = arith.index_cast %50 : i32 to index
    %c0_39 = arith.constant 0 : index
    %c0_40 = arith.constant 0 : index
    %86 = vector.load %arg4[%c0_38, %85, %c0_39, %c0_40] : memref<1x8x8x32xf32, #tpu.memory_space<vmem>>, vector<1x1x8x32xf32>
    %87 = vector.shape_cast %86 : vector<1x1x8x32xf32> to vector<8x32xf32>
    %88 = vector.shape_cast %82 : vector<8x32xf32> to vector<1x1x8x32xf32>
    tpu.vector_store %arg4[%c0_38, %85, %c0_39, %c0_40], %88 {strides = array<i32>} : memref<1x8x8x32xf32, #tpu.memory_space<vmem>>, vector<1x1x8x32xf32>,
    %c2_i32_41 = arith.constant 2 : i32
    %c2_i32_42 = arith.constant 2 : i32
    %89 = arith.muli %c2_i32_42, %c2_i32_41 : i32
    %c7_i32_43 = arith.constant 7 : i32
    %90 = arith.subi %c7_i32_43, %89 : i32
    %91 = arith.muli %arg0, %90 : i32
    %92 = arith.addi %c2_i32_41, %91 : i32
    %c0_44 = arith.constant 0 : index
    %93 = arith.index_cast %92 : i32 to index
    %c0_45 = arith.constant 0 : index
    %c0_46 = arith.constant 0 : index
    %94 = vector.load %arg2[%c0_44, %93, %c0_45, %c0_46] : memref<1x8x8x128xf32, #tpu.memory_space<vmem>>, vector<1x1x8x128xf32>
    %95 = vector.shape_cast %94 : vector<1x1x8x128xf32> to vector<8x128xf32>
    %c0_47 = arith.constant 0 : index
    %c0_48 = arith.constant 0 : index
    %96 = vector.load %arg5[%c0_47, %c0_48] : memref<8x32xf32, #tpu.memory_space<vmem>>, vector<8x32xf32>
    %cst_49 = arith.constant dense<0.000000e+00> : vector<8x128xf32>
    %97 = tpu.matmul %96, %4, %cst_49 {dimension_numbers = #tpu.dot_dimension_numbers<[1], [0], [0], [1], [0, 0, 1, 1], [], []>} : vector<8x32xf32>, vector<32x128xf32>, vector<8x128xf32> -> vector<8x128xf32>
    %98 = arith.addf %95, %97 : vector<8x128xf32>
    %99 = vector.extract_strided_slice %98 {offsets = [0, 0], sizes = [8, 32], strides = [1, 1]} : vector<8x128xf32> to vector<8x32xf32>
    %100 = arith.negf %99 : vector<8x32xf32>
    %101 = math.exp %100 : vector<8x32xf32>
    %cst_50 = arith.constant 1.000000e+00 : f32
    %102 = vector.broadcast %cst_50 : f32 to vector<8x32xf32>
    %103 = arith.addf %102, %101 : vector<8x32xf32>
    %104 = arith.divf %102, %103 : vector<8x32xf32>
    %105 = vector.extract_strided_slice %98 {offsets = [0, 32], sizes = [8, 32], strides = [1, 1]} : vector<8x128xf32> to vector<8x32xf32>
    %106 = arith.negf %105 : vector<8x32xf32>
    %107 = math.exp %106 : vector<8x32xf32>
    %cst_51 = arith.constant 1.000000e+00 : f32
    %108 = vector.broadcast %cst_51 : f32 to vector<8x32xf32>
    %109 = arith.addf %108, %107 : vector<8x32xf32>
    %110 = arith.divf %108, %109 : vector<8x32xf32>
    %111 = vector.extract_strided_slice %98 {offsets = [0, 64], sizes = [8, 32], strides = [1, 1]} : vector<8x128xf32> to vector<8x32xf32>
    %112 = math.tanh %111 : vector<8x32xf32>
    %113 = vector.extract_strided_slice %98 {offsets = [0, 96], sizes = [8, 32], strides = [1, 1]} : vector<8x128xf32> to vector<8x32xf32>
    %114 = arith.negf %113 : vector<8x32xf32>
    %115 = math.exp %114 : vector<8x32xf32>
    %cst_52 = arith.constant 1.000000e+00 : f32
    %116 = vector.broadcast %cst_52 : f32 to vector<8x32xf32>
    %117 = arith.addf %116, %115 : vector<8x32xf32>
    %118 = arith.divf %116, %117 : vector<8x32xf32>
    %c0_53 = arith.constant 0 : index
    %c0_54 = arith.constant 0 : index
    %119 = vector.load %arg6[%c0_53, %c0_54] : memref<8x32xf32, #tpu.memory_space<vmem>>, vector<8x32xf32>
    %120 = arith.mulf %110, %119 : vector<8x32xf32>
    %121 = arith.mulf %104, %112 : vector<8x32xf32>
    %122 = arith.addf %120, %121 : vector<8x32xf32>
    %123 = math.tanh %122 : vector<8x32xf32>
    %124 = arith.mulf %118, %123 : vector<8x32xf32>
    %c0_55 = arith.constant 0 : index
    %c0_56 = arith.constant 0 : index
    %125 = vector.load %arg6[%c0_55, %c0_56] : memref<8x32xf32, #tpu.memory_space<vmem>>, vector<8x32xf32>
    tpu.vector_store %arg6[%c0_55, %c0_56], %122 {strides = array<i32>} : memref<8x32xf32, #tpu.memory_space<vmem>>, vector<8x32xf32>,
    %c0_57 = arith.constant 0 : index
    %c0_58 = arith.constant 0 : index
    %126 = vector.load %arg5[%c0_57, %c0_58] : memref<8x32xf32, #tpu.memory_space<vmem>>, vector<8x32xf32>
    tpu.vector_store %arg5[%c0_57, %c0_58], %124 {strides = array<i32>} : memref<8x32xf32, #tpu.memory_space<vmem>>, vector<8x32xf32>,
    %c0_59 = arith.constant 0 : index
    %127 = arith.index_cast %92 : i32 to index
    %c0_60 = arith.constant 0 : index
    %c0_61 = arith.constant 0 : index
    %128 = vector.load %arg4[%c0_59, %127, %c0_60, %c0_61] : memref<1x8x8x32xf32, #tpu.memory_space<vmem>>, vector<1x1x8x32xf32>
    %129 = vector.shape_cast %128 : vector<1x1x8x32xf32> to vector<8x32xf32>
    %130 = vector.shape_cast %124 : vector<8x32xf32> to vector<1x1x8x32xf32>
    tpu.vector_store %arg4[%c0_59, %127, %c0_60, %c0_61], %130 {strides = array<i32>} : memref<1x8x8x32xf32, #tpu.memory_space<vmem>>, vector<1x1x8x32xf32>,
    %c3_i32 = arith.constant 3 : i32
    %c2_i32_62 = arith.constant 2 : i32
    %131 = arith.muli %c2_i32_62, %c3_i32 : i32
    %c7_i32_63 = arith.constant 7 : i32
    %132 = arith.subi %c7_i32_63, %131 : i32
    %133 = arith.muli %arg0, %132 : i32
    %134 = arith.addi %c3_i32, %133 : i32
    %c0_64 = arith.constant 0 : index
    %135 = arith.index_cast %134 : i32 to index
    %c0_65 = arith.constant 0 : index
    %c0_66 = arith.constant 0 : index
    %136 = vector.load %arg2[%c0_64, %135, %c0_65, %c0_66] : memref<1x8x8x128xf32, #tpu.memory_space<vmem>>, vector<1x1x8x128xf32>
    %137 = vector.shape_cast %136 : vector<1x1x8x128xf32> to vector<8x128xf32>
    %c0_67 = arith.constant 0 : index
    %c0_68 = arith.constant 0 : index
    %138 = vector.load %arg5[%c0_67, %c0_68] : memref<8x32xf32, #tpu.memory_space<vmem>>, vector<8x32xf32>
    %cst_69 = arith.constant dense<0.000000e+00> : vector<8x128xf32>
    %139 = tpu.matmul %138, %4, %cst_69 {dimension_numbers = #tpu.dot_dimension_numbers<[1], [0], [0], [1], [0, 0, 1, 1], [], []>} : vector<8x32xf32>, vector<32x128xf32>, vector<8x128xf32> -> vector<8x128xf32>
    %140 = arith.addf %137, %139 : vector<8x128xf32>
    %141 = vector.extract_strided_slice %140 {offsets = [0, 0], sizes = [8, 32], strides = [1, 1]} : vector<8x128xf32> to vector<8x32xf32>
    %142 = arith.negf %141 : vector<8x32xf32>
    %143 = math.exp %142 : vector<8x32xf32>
    %cst_70 = arith.constant 1.000000e+00 : f32
    %144 = vector.broadcast %cst_70 : f32 to vector<8x32xf32>
    %145 = arith.addf %144, %143 : vector<8x32xf32>
    %146 = arith.divf %144, %145 : vector<8x32xf32>
    %147 = vector.extract_strided_slice %140 {offsets = [0, 32], sizes = [8, 32], strides = [1, 1]} : vector<8x128xf32> to vector<8x32xf32>
    %148 = arith.negf %147 : vector<8x32xf32>
    %149 = math.exp %148 : vector<8x32xf32>
    %cst_71 = arith.constant 1.000000e+00 : f32
    %150 = vector.broadcast %cst_71 : f32 to vector<8x32xf32>
    %151 = arith.addf %150, %149 : vector<8x32xf32>
    %152 = arith.divf %150, %151 : vector<8x32xf32>
    %153 = vector.extract_strided_slice %140 {offsets = [0, 64], sizes = [8, 32], strides = [1, 1]} : vector<8x128xf32> to vector<8x32xf32>
    %154 = math.tanh %153 : vector<8x32xf32>
    %155 = vector.extract_strided_slice %140 {offsets = [0, 96], sizes = [8, 32], strides = [1, 1]} : vector<8x128xf32> to vector<8x32xf32>
    %156 = arith.negf %155 : vector<8x32xf32>
    %157 = math.exp %156 : vector<8x32xf32>
    %cst_72 = arith.constant 1.000000e+00 : f32
    %158 = vector.broadcast %cst_72 : f32 to vector<8x32xf32>
    %159 = arith.addf %158, %157 : vector<8x32xf32>
    %160 = arith.divf %158, %159 : vector<8x32xf32>
    %c0_73 = arith.constant 0 : index
    %c0_74 = arith.constant 0 : index
    %161 = vector.load %arg6[%c0_73, %c0_74] : memref<8x32xf32, #tpu.memory_space<vmem>>, vector<8x32xf32>
    %162 = arith.mulf %152, %161 : vector<8x32xf32>
    %163 = arith.mulf %146, %154 : vector<8x32xf32>
    %164 = arith.addf %162, %163 : vector<8x32xf32>
    %165 = math.tanh %164 : vector<8x32xf32>
    %166 = arith.mulf %160, %165 : vector<8x32xf32>
    %c0_75 = arith.constant 0 : index
    %c0_76 = arith.constant 0 : index
    %167 = vector.load %arg6[%c0_75, %c0_76] : memref<8x32xf32, #tpu.memory_space<vmem>>, vector<8x32xf32>
    tpu.vector_store %arg6[%c0_75, %c0_76], %164 {strides = array<i32>} : memref<8x32xf32, #tpu.memory_space<vmem>>, vector<8x32xf32>,
    %c0_77 = arith.constant 0 : index
    %c0_78 = arith.constant 0 : index
    %168 = vector.load %arg5[%c0_77, %c0_78] : memref<8x32xf32, #tpu.memory_space<vmem>>, vector<8x32xf32>
    tpu.vector_store %arg5[%c0_77, %c0_78], %166 {strides = array<i32>} : memref<8x32xf32, #tpu.memory_space<vmem>>, vector<8x32xf32>,
    %c0_79 = arith.constant 0 : index
    %169 = arith.index_cast %134 : i32 to index
    %c0_80 = arith.constant 0 : index
    %c0_81 = arith.constant 0 : index
    %170 = vector.load %arg4[%c0_79, %169, %c0_80, %c0_81] : memref<1x8x8x32xf32, #tpu.memory_space<vmem>>, vector<1x1x8x32xf32>
    %171 = vector.shape_cast %170 : vector<1x1x8x32xf32> to vector<8x32xf32>
    %172 = vector.shape_cast %166 : vector<8x32xf32> to vector<1x1x8x32xf32>
    tpu.vector_store %arg4[%c0_79, %169, %c0_80, %c0_81], %172 {strides = array<i32>} : memref<1x8x8x32xf32, #tpu.memory_space<vmem>>, vector<1x1x8x32xf32>,
    %c4_i32 = arith.constant 4 : i32
    %c2_i32_82 = arith.constant 2 : i32
    %173 = arith.muli %c2_i32_82, %c4_i32 : i32
    %c7_i32_83 = arith.constant 7 : i32
    %174 = arith.subi %c7_i32_83, %173 : i32
    %175 = arith.muli %arg0, %174 : i32
    %176 = arith.addi %c4_i32, %175 : i32
    %c0_84 = arith.constant 0 : index
    %177 = arith.index_cast %176 : i32 to index
    %c0_85 = arith.constant 0 : index
    %c0_86 = arith.constant 0 : index
    %178 = vector.load %arg2[%c0_84, %177, %c0_85, %c0_86] : memref<1x8x8x128xf32, #tpu.memory_space<vmem>>, vector<1x1x8x128xf32>
    %179 = vector.shape_cast %178 : vector<1x1x8x128xf32> to vector<8x128xf32>
    %c0_87 = arith.constant 0 : index
    %c0_88 = arith.constant 0 : index
    %180 = vector.load %arg5[%c0_87, %c0_88] : memref<8x32xf32, #tpu.memory_space<vmem>>, vector<8x32xf32>
    %cst_89 = arith.constant dense<0.000000e+00> : vector<8x128xf32>
    %181 = tpu.matmul %180, %4, %cst_89 {dimension_numbers = #tpu.dot_dimension_numbers<[1], [0], [0], [1], [0, 0, 1, 1], [], []>} : vector<8x32xf32>, vector<32x128xf32>, vector<8x128xf32> -> vector<8x128xf32>
    %182 = arith.addf %179, %181 : vector<8x128xf32>
    %183 = vector.extract_strided_slice %182 {offsets = [0, 0], sizes = [8, 32], strides = [1, 1]} : vector<8x128xf32> to vector<8x32xf32>
    %184 = arith.negf %183 : vector<8x32xf32>
    %185 = math.exp %184 : vector<8x32xf32>
    %cst_90 = arith.constant 1.000000e+00 : f32
    %186 = vector.broadcast %cst_90 : f32 to vector<8x32xf32>
    %187 = arith.addf %186, %185 : vector<8x32xf32>
    %188 = arith.divf %186, %187 : vector<8x32xf32>
    %189 = vector.extract_strided_slice %182 {offsets = [0, 32], sizes = [8, 32], strides = [1, 1]} : vector<8x128xf32> to vector<8x32xf32>
    %190 = arith.negf %189 : vector<8x32xf32>
    %191 = math.exp %190 : vector<8x32xf32>
    %cst_91 = arith.constant 1.000000e+00 : f32
    %192 = vector.broadcast %cst_91 : f32 to vector<8x32xf32>
    %193 = arith.addf %192, %191 : vector<8x32xf32>
    %194 = arith.divf %192, %193 : vector<8x32xf32>
    %195 = vector.extract_strided_slice %182 {offsets = [0, 64], sizes = [8, 32], strides = [1, 1]} : vector<8x128xf32> to vector<8x32xf32>
    %196 = math.tanh %195 : vector<8x32xf32>
    %197 = vector.extract_strided_slice %182 {offsets = [0, 96], sizes = [8, 32], strides = [1, 1]} : vector<8x128xf32> to vector<8x32xf32>
    %198 = arith.negf %197 : vector<8x32xf32>
    %199 = math.exp %198 : vector<8x32xf32>
    %cst_92 = arith.constant 1.000000e+00 : f32
    %200 = vector.broadcast %cst_92 : f32 to vector<8x32xf32>
    %201 = arith.addf %200, %199 : vector<8x32xf32>
    %202 = arith.divf %200, %201 : vector<8x32xf32>
    %c0_93 = arith.constant 0 : index
    %c0_94 = arith.constant 0 : index
    %203 = vector.load %arg6[%c0_93, %c0_94] : memref<8x32xf32, #tpu.memory_space<vmem>>, vector<8x32xf32>
    %204 = arith.mulf %194, %203 : vector<8x32xf32>
    %205 = arith.mulf %188, %196 : vector<8x32xf32>
    %206 = arith.addf %204, %205 : vector<8x32xf32>
    %207 = math.tanh %206 : vector<8x32xf32>
    %208 = arith.mulf %202, %207 : vector<8x32xf32>
    %c0_95 = arith.constant 0 : index
    %c0_96 = arith.constant 0 : index
    %209 = vector.load %arg6[%c0_95, %c0_96] : memref<8x32xf32, #tpu.memory_space<vmem>>, vector<8x32xf32>
    tpu.vector_store %arg6[%c0_95, %c0_96], %206 {strides = array<i32>} : memref<8x32xf32, #tpu.memory_space<vmem>>, vector<8x32xf32>,
    %c0_97 = arith.constant 0 : index
    %c0_98 = arith.constant 0 : index
    %210 = vector.load %arg5[%c0_97, %c0_98] : memref<8x32xf32, #tpu.memory_space<vmem>>, vector<8x32xf32>
    tpu.vector_store %arg5[%c0_97, %c0_98], %208 {strides = array<i32>} : memref<8x32xf32, #tpu.memory_space<vmem>>, vector<8x32xf32>,
    %c0_99 = arith.constant 0 : index
    %211 = arith.index_cast %176 : i32 to index
    %c0_100 = arith.constant 0 : index
    %c0_101 = arith.constant 0 : index
    %212 = vector.load %arg4[%c0_99, %211, %c0_100, %c0_101] : memref<1x8x8x32xf32, #tpu.memory_space<vmem>>, vector<1x1x8x32xf32>
    %213 = vector.shape_cast %212 : vector<1x1x8x32xf32> to vector<8x32xf32>
    %214 = vector.shape_cast %208 : vector<8x32xf32> to vector<1x1x8x32xf32>
    tpu.vector_store %arg4[%c0_99, %211, %c0_100, %c0_101], %214 {strides = array<i32>} : memref<1x8x8x32xf32, #tpu.memory_space<vmem>>, vector<1x1x8x32xf32>,
    %c5_i32 = arith.constant 5 : i32
    %c2_i32_102 = arith.constant 2 : i32
    %215 = arith.muli %c2_i32_102, %c5_i32 : i32
    %c7_i32_103 = arith.constant 7 : i32
    %216 = arith.subi %c7_i32_103, %215 : i32
    %217 = arith.muli %arg0, %216 : i32
    %218 = arith.addi %c5_i32, %217 : i32
    %c0_104 = arith.constant 0 : index
    %219 = arith.index_cast %218 : i32 to index
    %c0_105 = arith.constant 0 : index
    %c0_106 = arith.constant 0 : index
    %220 = vector.load %arg2[%c0_104, %219, %c0_105, %c0_106] : memref<1x8x8x128xf32, #tpu.memory_space<vmem>>, vector<1x1x8x128xf32>
    %221 = vector.shape_cast %220 : vector<1x1x8x128xf32> to vector<8x128xf32>
    %c0_107 = arith.constant 0 : index
    %c0_108 = arith.constant 0 : index
    %222 = vector.load %arg5[%c0_107, %c0_108] : memref<8x32xf32, #tpu.memory_space<vmem>>, vector<8x32xf32>
    %cst_109 = arith.constant dense<0.000000e+00> : vector<8x128xf32>
    %223 = tpu.matmul %222, %4, %cst_109 {dimension_numbers = #tpu.dot_dimension_numbers<[1], [0], [0], [1], [0, 0, 1, 1], [], []>} : vector<8x32xf32>, vector<32x128xf32>, vector<8x128xf32> -> vector<8x128xf32>
    %224 = arith.addf %221, %223 : vector<8x128xf32>
    %225 = vector.extract_strided_slice %224 {offsets = [0, 0], sizes = [8, 32], strides = [1, 1]} : vector<8x128xf32> to vector<8x32xf32>
    %226 = arith.negf %225 : vector<8x32xf32>
    %227 = math.exp %226 : vector<8x32xf32>
    %cst_110 = arith.constant 1.000000e+00 : f32
    %228 = vector.broadcast %cst_110 : f32 to vector<8x32xf32>
    %229 = arith.addf %228, %227 : vector<8x32xf32>
    %230 = arith.divf %228, %229 : vector<8x32xf32>
    %231 = vector.extract_strided_slice %224 {offsets = [0, 32], sizes = [8, 32], strides = [1, 1]} : vector<8x128xf32> to vector<8x32xf32>
    %232 = arith.negf %231 : vector<8x32xf32>
    %233 = math.exp %232 : vector<8x32xf32>
    %cst_111 = arith.constant 1.000000e+00 : f32
    %234 = vector.broadcast %cst_111 : f32 to vector<8x32xf32>
    %235 = arith.addf %234, %233 : vector<8x32xf32>
    %236 = arith.divf %234, %235 : vector<8x32xf32>
    %237 = vector.extract_strided_slice %224 {offsets = [0, 64], sizes = [8, 32], strides = [1, 1]} : vector<8x128xf32> to vector<8x32xf32>
    %238 = math.tanh %237 : vector<8x32xf32>
    %239 = vector.extract_strided_slice %224 {offsets = [0, 96], sizes = [8, 32], strides = [1, 1]} : vector<8x128xf32> to vector<8x32xf32>
    %240 = arith.negf %239 : vector<8x32xf32>
    %241 = math.exp %240 : vector<8x32xf32>
    %cst_112 = arith.constant 1.000000e+00 : f32
    %242 = vector.broadcast %cst_112 : f32 to vector<8x32xf32>
    %243 = arith.addf %242, %241 : vector<8x32xf32>
    %244 = arith.divf %242, %243 : vector<8x32xf32>
    %c0_113 = arith.constant 0 : index
    %c0_114 = arith.constant 0 : index
    %245 = vector.load %arg6[%c0_113, %c0_114] : memref<8x32xf32, #tpu.memory_space<vmem>>, vector<8x32xf32>
    %246 = arith.mulf %236, %245 : vector<8x32xf32>
    %247 = arith.mulf %230, %238 : vector<8x32xf32>
    %248 = arith.addf %246, %247 : vector<8x32xf32>
    %249 = math.tanh %248 : vector<8x32xf32>
    %250 = arith.mulf %244, %249 : vector<8x32xf32>
    %c0_115 = arith.constant 0 : index
    %c0_116 = arith.constant 0 : index
    %251 = vector.load %arg6[%c0_115, %c0_116] : memref<8x32xf32, #tpu.memory_space<vmem>>, vector<8x32xf32>
    tpu.vector_store %arg6[%c0_115, %c0_116], %248 {strides = array<i32>} : memref<8x32xf32, #tpu.memory_space<vmem>>, vector<8x32xf32>,
    %c0_117 = arith.constant 0 : index
    %c0_118 = arith.constant 0 : index
    %252 = vector.load %arg5[%c0_117, %c0_118] : memref<8x32xf32, #tpu.memory_space<vmem>>, vector<8x32xf32>
    tpu.vector_store %arg5[%c0_117, %c0_118], %250 {strides = array<i32>} : memref<8x32xf32, #tpu.memory_space<vmem>>, vector<8x32xf32>,
    %c0_119 = arith.constant 0 : index
    %253 = arith.index_cast %218 : i32 to index
    %c0_120 = arith.constant 0 : index
    %c0_121 = arith.constant 0 : index
    %254 = vector.load %arg4[%c0_119, %253, %c0_120, %c0_121] : memref<1x8x8x32xf32, #tpu.memory_space<vmem>>, vector<1x1x8x32xf32>
    %255 = vector.shape_cast %254 : vector<1x1x8x32xf32> to vector<8x32xf32>
    %256 = vector.shape_cast %250 : vector<8x32xf32> to vector<1x1x8x32xf32>
    tpu.vector_store %arg4[%c0_119, %253, %c0_120, %c0_121], %256 {strides = array<i32>} : memref<1x8x8x32xf32, #tpu.memory_space<vmem>>, vector<1x1x8x32xf32>,
    %c6_i32 = arith.constant 6 : i32
    %c2_i32_122 = arith.constant 2 : i32
    %257 = arith.muli %c2_i32_122, %c6_i32 : i32
    %c7_i32_123 = arith.constant 7 : i32
    %258 = arith.subi %c7_i32_123, %257 : i32
    %259 = arith.muli %arg0, %258 : i32
    %260 = arith.addi %c6_i32, %259 : i32
    %c0_124 = arith.constant 0 : index
    %261 = arith.index_cast %260 : i32 to index
    %c0_125 = arith.constant 0 : index
    %c0_126 = arith.constant 0 : index
    %262 = vector.load %arg2[%c0_124, %261, %c0_125, %c0_126] : memref<1x8x8x128xf32, #tpu.memory_space<vmem>>, vector<1x1x8x128xf32>
    %263 = vector.shape_cast %262 : vector<1x1x8x128xf32> to vector<8x128xf32>
    %c0_127 = arith.constant 0 : index
    %c0_128 = arith.constant 0 : index
    %264 = vector.load %arg5[%c0_127, %c0_128] : memref<8x32xf32, #tpu.memory_space<vmem>>, vector<8x32xf32>
    %cst_129 = arith.constant dense<0.000000e+00> : vector<8x128xf32>
    %265 = tpu.matmul %264, %4, %cst_129 {dimension_numbers = #tpu.dot_dimension_numbers<[1], [0], [0], [1], [0, 0, 1, 1], [], []>} : vector<8x32xf32>, vector<32x128xf32>, vector<8x128xf32> -> vector<8x128xf32>
    %266 = arith.addf %263, %265 : vector<8x128xf32>
    %267 = vector.extract_strided_slice %266 {offsets = [0, 0], sizes = [8, 32], strides = [1, 1]} : vector<8x128xf32> to vector<8x32xf32>
    %268 = arith.negf %267 : vector<8x32xf32>
    %269 = math.exp %268 : vector<8x32xf32>
    %cst_130 = arith.constant 1.000000e+00 : f32
    %270 = vector.broadcast %cst_130 : f32 to vector<8x32xf32>
    %271 = arith.addf %270, %269 : vector<8x32xf32>
    %272 = arith.divf %270, %271 : vector<8x32xf32>
    %273 = vector.extract_strided_slice %266 {offsets = [0, 32], sizes = [8, 32], strides = [1, 1]} : vector<8x128xf32> to vector<8x32xf32>
    %274 = arith.negf %273 : vector<8x32xf32>
    %275 = math.exp %274 : vector<8x32xf32>
    %cst_131 = arith.constant 1.000000e+00 : f32
    %276 = vector.broadcast %cst_131 : f32 to vector<8x32xf32>
    %277 = arith.addf %276, %275 : vector<8x32xf32>
    %278 = arith.divf %276, %277 : vector<8x32xf32>
    %279 = vector.extract_strided_slice %266 {offsets = [0, 64], sizes = [8, 32], strides = [1, 1]} : vector<8x128xf32> to vector<8x32xf32>
    %280 = math.tanh %279 : vector<8x32xf32>
    %281 = vector.extract_strided_slice %266 {offsets = [0, 96], sizes = [8, 32], strides = [1, 1]} : vector<8x128xf32> to vector<8x32xf32>
    %282 = arith.negf %281 : vector<8x32xf32>
    %283 = math.exp %282 : vector<8x32xf32>
    %cst_132 = arith.constant 1.000000e+00 : f32
    %284 = vector.broadcast %cst_132 : f32 to vector<8x32xf32>
    %285 = arith.addf %284, %283 : vector<8x32xf32>
    %286 = arith.divf %284, %285 : vector<8x32xf32>
    %c0_133 = arith.constant 0 : index
    %c0_134 = arith.constant 0 : index
    %287 = vector.load %arg6[%c0_133, %c0_134] : memref<8x32xf32, #tpu.memory_space<vmem>>, vector<8x32xf32>
    %288 = arith.mulf %278, %287 : vector<8x32xf32>
    %289 = arith.mulf %272, %280 : vector<8x32xf32>
    %290 = arith.addf %288, %289 : vector<8x32xf32>
    %291 = math.tanh %290 : vector<8x32xf32>
    %292 = arith.mulf %286, %291 : vector<8x32xf32>
    %c0_135 = arith.constant 0 : index
    %c0_136 = arith.constant 0 : index
    %293 = vector.load %arg6[%c0_135, %c0_136] : memref<8x32xf32, #tpu.memory_space<vmem>>, vector<8x32xf32>
    tpu.vector_store %arg6[%c0_135, %c0_136], %290 {strides = array<i32>} : memref<8x32xf32, #tpu.memory_space<vmem>>, vector<8x32xf32>,
    %c0_137 = arith.constant 0 : index
    %c0_138 = arith.constant 0 : index
    %294 = vector.load %arg5[%c0_137, %c0_138] : memref<8x32xf32, #tpu.memory_space<vmem>>, vector<8x32xf32>
    tpu.vector_store %arg5[%c0_137, %c0_138], %292 {strides = array<i32>} : memref<8x32xf32, #tpu.memory_space<vmem>>, vector<8x32xf32>,
    %c0_139 = arith.constant 0 : index
    %295 = arith.index_cast %260 : i32 to index
    %c0_140 = arith.constant 0 : index
    %c0_141 = arith.constant 0 : index
    %296 = vector.load %arg4[%c0_139, %295, %c0_140, %c0_141] : memref<1x8x8x32xf32, #tpu.memory_space<vmem>>, vector<1x1x8x32xf32>
    %297 = vector.shape_cast %296 : vector<1x1x8x32xf32> to vector<8x32xf32>
    %298 = vector.shape_cast %292 : vector<8x32xf32> to vector<1x1x8x32xf32>
    tpu.vector_store %arg4[%c0_139, %295, %c0_140, %c0_141], %298 {strides = array<i32>} : memref<1x8x8x32xf32, #tpu.memory_space<vmem>>, vector<1x1x8x32xf32>,
    %c7_i32_142 = arith.constant 7 : i32
    %c2_i32_143 = arith.constant 2 : i32
    %299 = arith.muli %c2_i32_143, %c7_i32_142 : i32
    %c7_i32_144 = arith.constant 7 : i32
    %300 = arith.subi %c7_i32_144, %299 : i32
    %301 = arith.muli %arg0, %300 : i32
    %302 = arith.addi %c7_i32_142, %301 : i32
    %c0_145 = arith.constant 0 : index
    %303 = arith.index_cast %302 : i32 to index
    %c0_146 = arith.constant 0 : index
    %c0_147 = arith.constant 0 : index
    %304 = vector.load %arg2[%c0_145, %303, %c0_146, %c0_147] : memref<1x8x8x128xf32, #tpu.memory_space<vmem>>, vector<1x1x8x128xf32>
    %305 = vector.shape_cast %304 : vector<1x1x8x128xf32> to vector<8x128xf32>
    %c0_148 = arith.constant 0 : index
    %c0_149 = arith.constant 0 : index
    %306 = vector.load %arg5[%c0_148, %c0_149] : memref<8x32xf32, #tpu.memory_space<vmem>>, vector<8x32xf32>
    %cst_150 = arith.constant dense<0.000000e+00> : vector<8x128xf32>
    %307 = tpu.matmul %306, %4, %cst_150 {dimension_numbers = #tpu.dot_dimension_numbers<[1], [0], [0], [1], [0, 0, 1, 1], [], []>} : vector<8x32xf32>, vector<32x128xf32>, vector<8x128xf32> -> vector<8x128xf32>
    %308 = arith.addf %305, %307 : vector<8x128xf32>
    %309 = vector.extract_strided_slice %308 {offsets = [0, 0], sizes = [8, 32], strides = [1, 1]} : vector<8x128xf32> to vector<8x32xf32>
    %310 = arith.negf %309 : vector<8x32xf32>
    %311 = math.exp %310 : vector<8x32xf32>
    %cst_151 = arith.constant 1.000000e+00 : f32
    %312 = vector.broadcast %cst_151 : f32 to vector<8x32xf32>
    %313 = arith.addf %312, %311 : vector<8x32xf32>
    %314 = arith.divf %312, %313 : vector<8x32xf32>
    %315 = vector.extract_strided_slice %308 {offsets = [0, 32], sizes = [8, 32], strides = [1, 1]} : vector<8x128xf32> to vector<8x32xf32>
    %316 = arith.negf %315 : vector<8x32xf32>
    %317 = math.exp %316 : vector<8x32xf32>
    %cst_152 = arith.constant 1.000000e+00 : f32
    %318 = vector.broadcast %cst_152 : f32 to vector<8x32xf32>
    %319 = arith.addf %318, %317 : vector<8x32xf32>
    %320 = arith.divf %318, %319 : vector<8x32xf32>
    %321 = vector.extract_strided_slice %308 {offsets = [0, 64], sizes = [8, 32], strides = [1, 1]} : vector<8x128xf32> to vector<8x32xf32>
    %322 = math.tanh %321 : vector<8x32xf32>
    %323 = vector.extract_strided_slice %308 {offsets = [0, 96], sizes = [8, 32], strides = [1, 1]} : vector<8x128xf32> to vector<8x32xf32>
    %324 = arith.negf %323 : vector<8x32xf32>
    %325 = math.exp %324 : vector<8x32xf32>
    %cst_153 = arith.constant 1.000000e+00 : f32
    %326 = vector.broadcast %cst_153 : f32 to vector<8x32xf32>
    %327 = arith.addf %326, %325 : vector<8x32xf32>
    %328 = arith.divf %326, %327 : vector<8x32xf32>
    %c0_154 = arith.constant 0 : index
    %c0_155 = arith.constant 0 : index
    %329 = vector.load %arg6[%c0_154, %c0_155] : memref<8x32xf32, #tpu.memory_space<vmem>>, vector<8x32xf32>
    %330 = arith.mulf %320, %329 : vector<8x32xf32>
    %331 = arith.mulf %314, %322 : vector<8x32xf32>
    %332 = arith.addf %330, %331 : vector<8x32xf32>
    %333 = math.tanh %332 : vector<8x32xf32>
    %334 = arith.mulf %328, %333 : vector<8x32xf32>
    %c0_156 = arith.constant 0 : index
    %c0_157 = arith.constant 0 : index
    %335 = vector.load %arg6[%c0_156, %c0_157] : memref<8x32xf32, #tpu.memory_space<vmem>>, vector<8x32xf32>
    tpu.vector_store %arg6[%c0_156, %c0_157], %332 {strides = array<i32>} : memref<8x32xf32, #tpu.memory_space<vmem>>, vector<8x32xf32>,
    %c0_158 = arith.constant 0 : index
    %c0_159 = arith.constant 0 : index
    %336 = vector.load %arg5[%c0_158, %c0_159] : memref<8x32xf32, #tpu.memory_space<vmem>>, vector<8x32xf32>
    tpu.vector_store %arg5[%c0_158, %c0_159], %334 {strides = array<i32>} : memref<8x32xf32, #tpu.memory_space<vmem>>, vector<8x32xf32>,
    %c0_160 = arith.constant 0 : index
    %337 = arith.index_cast %302 : i32 to index
    %c0_161 = arith.constant 0 : index
    %c0_162 = arith.constant 0 : index
    %338 = vector.load %arg4[%c0_160, %337, %c0_161, %c0_162] : memref<1x8x8x32xf32, #tpu.memory_space<vmem>>, vector<1x1x8x32xf32>
    %339 = vector.shape_cast %338 : vector<1x1x8x32xf32> to vector<8x32xf32>
    %340 = vector.shape_cast %334 : vector<8x32xf32> to vector<1x1x8x32xf32>
    tpu.vector_store %arg4[%c0_160, %337, %c0_161, %c0_162], %340 {strides = array<i32>} : memref<1x8x8x32xf32, #tpu.memory_space<vmem>>, vector<1x1x8x32xf32>,
    %c8_i32 = arith.constant 8 : i32
    return
  }
  func.func @transform_0(%arg0: i32, %arg1: i32) -> (i32, i32, i32, i32) {
    %c2_i32 = arith.constant 2 : i32
    %0 = arith.muli %c2_i32, %arg1 : i32
    %c0_i32 = arith.constant 0 : i32
    %1 = arith.subi %c0_i32, %0 : i32
    %2 = arith.muli %arg0, %1 : i32
    %3 = arith.addi %arg1, %2 : i32
    %c0_i32_0 = arith.constant 0 : i32
    %c0_i32_1 = arith.constant 0 : i32
    %c0_i32_2 = arith.constant 0 : i32
    return %arg0, %3, %c0_i32_0, %c0_i32_1 : i32, i32, i32, i32
  }
  func.func @transform_1(%arg0: i32, %arg1: i32) -> (i32, i32, i32) {
    %c0_i32 = arith.constant 0 : i32
    %c0_i32_0 = arith.constant 0 : i32
    %c0_i32_1 = arith.constant 0 : i32
    return %arg0, %c0_i32, %c0_i32_0 : i32, i32, i32
  }
  func.func @transform_2(%arg0: i32, %arg1: i32) -> (i32, i32, i32, i32) {
    %c2_i32 = arith.constant 2 : i32
    %0 = arith.muli %c2_i32, %arg1 : i32
    %c0_i32 = arith.constant 0 : i32
    %1 = arith.subi %c0_i32, %0 : i32
    %2 = arith.muli %arg0, %1 : i32
    %3 = arith.addi %arg1, %2 : i32
    %c0_i32_0 = arith.constant 0 : i32
    %c0_i32_1 = arith.constant 0 : i32
    %c0_i32_2 = arith.constant 0 : i32
    return %arg0, %3, %c0_i32_0, %c0_i32_1 : i32, i32, i32, i32
  }
}

</mosaic_0001>

<bundles_post_ra>
// kernel: rnn_forward.4
= control target key start
LH: loop header
LB: loop body
LE: loop exit
PB: predicated region body
PF: predicated region fallthrough
CT: control target
= control target key end

     0   :  { %s504_s12 = smov 0   ;;  %s561_s0 = inlined_call_operand.vmem [shape: f32[1,64,32], index: 0, kind: input, shape index: {}]   ;;  %s562_s1 = inlined_call_operand.vmem [shape: f32[2,1,32,128], index: 1, kind: input, shape index: {}]   ;;  %s563_s2 = inlined_call_operand.vmem [shape: f32[2,1,128], index: 2, kind: input, shape index: {}]   ;;  %s564_s3 = inlined_call_operand.vmem [shape: f32[2,64,128], index: 3, kind: output, shape index: {}]  }
   0x1 LB: > { %s406_s13 = sadd.s32 4294967295, %s482_s12   ;;  %p410_p0 = scmp.ge.s32.totalorder %s482_s12, 1  ;;  %s482_s12 = sphi %s504_s12, %s13_s12  }
   0x2   : > { %p145_p1 = scmp.lt.s32.totalorder %s482_s12, 3 }
   0x4   : > { %p146_p2 = pnand %p410_p0, %p145_p1 }
   0x5   : > { %p172_p3 = scmp.lt.s32.totalorder (!%p146_p2), %s406_s13, 1 }
   0x6   : > { %149 = sbr.rel (%p146_p2) target bundleno = 225 (0xe1), region = 32 }
   0xb   : > { %v185_v0 = vld [vmem:[%s561_s0] sm:$0xff]  ;;  %vm204_vm0 = vcmask 261120   ;;  %s566_s13 = smov (!%p172_p3, %s406_s13), 1  ;;  %v186_v6 = vld [vmem:[%s561_s0 + $0x8] sm:$0xff]  ;;  %v187_v8 = vld [vmem:[%s561_s0 + $0x10] sm:$0xff] }
   0xc   : > { %v189_v1 = vld [vmem:[%s561_s0 + $0x20] sm:$0xff]  ;;  %448 = vmatprep.mubr.msk.f32.mxu0 %vm204_vm0, %v185_v0  ;;  %s426_s18 = sshll.u32 %s566_s13, 5  ;;  %v190_v7 = vld [vmem:[%s561_s0 + $0x28] sm:$0xff]  ;;  %v191_v9 = vld [vmem:[%s561_s0 + $0x30] sm:$0xff]  ;;  %s179_s9 = scalar_lea.vmem %s563_s2, %s566_s13 }
   0xd   : > { %454 = vmatprep.mubr.msk.f32.mxu1 %vm204_vm0, %v189_v1  ;;  %s176_s21 = scalar_lea.vmem %s562_s1, %s426_s18  ;;  %v188_v10 = vld [vmem:[%s561_s0 + $0x18] sm:$0xff]  ;;  %s427_s10 = sshll.u32 %s566_s13, 6  ;;  %v415_v12 = vld [vmem:[%s179_s9] ss:$0 sm:$0xff] }
   0xe   : > { %v196_v2 = vld [vmem:[%s176_s21 + $0x18] sm:$0xff]  ;;  %v195_v3 = vld [vmem:[%s176_s21 + $0x10] sm:$0xff]  ;;  %v194_v4 = vld [vmem:[%s176_s21 + $0x8] sm:$0xff]  ;;  %s184_s15 = scalar_lea.vmem %s564_s3, %s427_s10 }
   0xf   : > { %440 = vmatprep.subr.mxu0 %v196_v2  ;;  %460 = vmatprep.subr.mxu1 %v196_v2  ;;  %v193_v5 = vld [vmem:[%s176_s21] sm:$0xff]  ;;  %v192_v11 = vld [vmem:[%s561_s0 + $0x38] sm:$0xff] }
  0x10   : > { %441 = vmatpush3.msra.mxu0 %v196_v2  ;;  %464 = vmatpush3.msra.mxu1 %v196_v2 }
  0x11   : > { %442 = vmatprep.subr.mxu0 %v195_v3  ;;  %461 = vmatprep.subr.mxu1 %v195_v3 }
  0x12   : > { %443 = vmatpush3.msra.mxu0 %v195_v3  ;;  %465 = vmatpush3.msra.mxu1 %v195_v3 }
  0x13   : > { %444 = vmatprep.subr.mxu0 %v194_v4  ;;  %462 = vmatprep.subr.mxu1 %v194_v4 }
  0x14   : > { %445 = vmatpush3.msra.mxu0 %v194_v4  ;;  %466 = vmatpush3.msra.mxu1 %v194_v4 }
  0x15   : > { %446 = vmatprep.subr.mxu0 %v193_v5  ;;  %463 = vmatprep.subr.mxu1 %v193_v5 }
  0x16   : > { %447 = vmatpush3.msra.mxu0 %v193_v5  ;;  %467 = vmatpush3.msra.mxu1 %v193_v5 }
  0x17   : > { %449 = vmatmul.mubr.msk.f32.vlgmr.msra.gmra.mxu0 %vm204_vm0, %v186_v6  ;;  %455 = vmatmul.mubr.msk.f32.vlgmr.msra.gmra.mxu1 %vm204_vm0, %v190_v7 }
  0x18   : > { %451 = vmatprep.mubr.msk.f32.mxu0 %vm204_vm0, %v187_v8  ;;  %457 = vmatprep.mubr.msk.f32.mxu1 %vm204_vm0, %v191_v9 }
  0x1b   : > { %452 = vmatmul.mubr.msk.f32.gmra.mxu0 %vm204_vm0, %v188_v10  ;;  %458 = vmatmul.mubr.msk.f32.gmra.mxu1 %vm204_vm0, %v192_v11 }
  0xd7   : > { %v450_v13 = vpop.f32.mrf.mxu0  ;;  %v456_v14 = vpop.f32.mrf.mxu1 }
  0xd8   : > { %v301_v15 = vadd.f32 %v450_v13, %v415_v12  ;;  %v321_v16 = vadd.f32 %v456_v14, %v415_v12 }
  0xd9   : > { %v295_v17 = vpop.f32.mrf.mxu0  ;;  %v315_v18 = vpop.f32.mrf.mxu1 }
  0xda   : > { %335 = vst [vmem:[%s184_s15 + $0x8] sm:$0xff] %v301_v15  ;;  %339 = vst [vmem:[%s184_s15 + $0x28] sm:$0xff] %v321_v16  ;;  %v296_v19 = vadd.f32 %v415_v12, %v295_v17  ;;  %v316_v20 = vadd.f32 %v415_v12, %v315_v18 }
  0xdb   : > { %v453_v21 = vpop.f32.mrf.mxu0  ;;  %v459_v22 = vpop.f32.mrf.mxu1 }
  0xdc   : > { %334 = vst [vmem:[%s184_s15] sm:$0xff] %v296_v19  ;;  %338 = vst [vmem:[%s184_s15 + $0x20] sm:$0xff] %v316_v20  ;;  %v311_v23 = vadd.f32 %v453_v21, %v415_v12  ;;  %v331_v24 = vadd.f32 %v459_v22, %v415_v12 }
  0xdd   : > { %v305_v25 = vpop.f32.mrf.mxu0  ;;  %v325_v26 = vpop.f32.mrf.mxu1 }
  0xde   : > { %337 = vst [vmem:[%s184_s15 + $0x18] sm:$0xff] %v311_v23  ;;  %341 = vst [vmem:[%s184_s15 + $0x38] sm:$0xff] %v331_v24  ;;  %v306_v27 = vadd.f32 %v415_v12, %v305_v25  ;;  %v326_v28 = vadd.f32 %v415_v12, %v325_v26 }
  0xe0   : > { %336 = vst [vmem:[%s184_s15 + $0x10] sm:$0xff] %v306_v27  ;;  %340 = vst [vmem:[%s184_s15 + $0x30] sm:$0xff] %v326_v28 }
  0xe1 PF: > { %s13_s12 = sadd.s32 1, %s482_s12  }
  0xe2   : > { %p10_p4 = scmp.ge.s32.totalorder %s13_s12, 4  }
  0xe4   :  { %12 = sbr.rel (!%p10_p4) target bundleno = 1 (0x1), region = 65 }

// kernel: rnn_forward.6
= control target key start
LH: loop header
LB: loop body
LE: loop exit
PB: predicated region body
PF: predicated region fallthrough
CT: control target
= control target key end

     0   :  { %s699_s12 = smov 0   ;;  %s801_s0 = inlined_call_operand.vmem [shape: f32[2,64,32], index: 0, kind: input, shape index: {}]   ;;  %s802_s1 = inlined_call_operand.vmem [shape: f32[2,2,32,128], index: 1, kind: input, shape index: {}]   ;;  %s803_s2 = inlined_call_operand.vmem [shape: f32[2,1,128], index: 2, kind: input, shape index: {}]   ;;  %s804_s3 = inlined_call_operand.vmem [shape: f32[2,64,128], index: 3, kind: output, shape index: {}]  }
   0x1 LB: > { %s557_s13 = sadd.s32 4294967295, %s677_s12   ;;  %p561_p0 = scmp.ge.s32.totalorder %s677_s12, 1  ;;  %s677_s12 = sphi %s699_s12, %s13_s12  }
   0x2   : > { %p145_p1 = scmp.lt.s32.totalorder %s677_s12, 3 }
   0x4   : > { %p146_p2 = pnand %p561_p0, %p145_p1 }
   0x5   : > { %p172_p3 = scmp.lt.s32.totalorder (!%p146_p2), %s557_s13, 1 }
   0x6   : > { %149 = sbr.rel (%p146_p2) target bundleno = 236 (0xec), region = 32 }
   0xb   : > { %v566_v0 = vld [vmem:[%s801_s0 + $0x40] sm:$0xff]  ;;  %vm211_vm0 = vcmask 261120   ;;  %s806_s13 = smov (!%p172_p3, %s557_s13), 1  ;;  %v567_v10 = vld [vmem:[%s801_s0 + $0x48] sm:$0xff]  ;;  %v568_v12 = vld [vmem:[%s801_s0 + $0x50] sm:$0xff] }
   0xc   : > { %v185_v1 = vld [vmem:[%s801_s0] sm:$0xff]  ;;  %631 = vmatprep.mubr.msk.f32.mxu0 %vm211_vm0, %v566_v0  ;;  %s597_s18 = sshll.u32 %s806_s13, 6  ;;  %v186_v11 = vld [vmem:[%s801_s0 + $0x8] sm:$0xff]  ;;  %v187_v13 = vld [vmem:[%s801_s0 + $0x10] sm:$0xff]  ;;  %s179_s28 = scalar_lea.vmem %s803_s2, %s806_s13 }
   0xd   : > { %651 = vmatprep.mubr.msk.f32.mxu1 %vm211_vm0, %v185_v1  ;;  %s176_s21 = scalar_lea.vmem %s802_s1, %s597_s18  ;;  %v569_v14 = vld [vmem:[%s801_s0 + $0x58] sm:$0xff]  ;;  %v570_v16 = vld [vmem:[%s801_s0 + $0x60] sm:$0xff]  ;;  %v571_v18 = vld [vmem:[%s801_s0 + $0x68] sm:$0xff]  ;;  %s788_s4 = scalar_lea.vmem %s804_s3, %s597_s18 }
   0xe   : > { %v577_v2 = vld [vmem:[%s176_s21 + $0x38] sm:$0xff]  ;;  %v576_v4 = vld [vmem:[%s176_s21 + $0x30] sm:$0xff]  ;;  %v575_v6 = vld [vmem:[%s176_s21 + $0x28] sm:$0xff] }
   0xf   : > { %v196_v3 = vld [vmem:[%s176_s21 + $0x18] sm:$0xff]  ;;  %623 = vmatprep.subr.mxu0 %v577_v2  ;;  %v195_v5 = vld [vmem:[%s176_s21 + $0x10] sm:$0xff]  ;;  %v194_v7 = vld [vmem:[%s176_s21 + $0x8] sm:$0xff] }
  0x10   : > { %643 = vmatprep.subr.mxu1 %v196_v3  ;;  %624 = vmatpush3.msra.mxu0 %v577_v2  ;;  %v574_v8 = vld [vmem:[%s176_s21 + $0x20] sm:$0xff]  ;;  %v188_v15 = vld [vmem:[%s801_s0 + $0x18] sm:$0xff]  ;;  %v190_v19 = vld [vmem:[%s801_s0 + $0x28] sm:$0xff] }
  0x11   : > { %644 = vmatpush3.msra.mxu1 %v196_v3  ;;  %625 = vmatprep.subr.mxu0 %v576_v4  ;;  %v193_v9 = vld [vmem:[%s176_s21] sm:$0xff]  ;;  %v572_v20 = vld [vmem:[%s801_s0 + $0x70] sm:$0xff]  ;;  %v573_v22 = vld [vmem:[%s801_s0 + $0x78] sm:$0xff] }
  0x12   : > { %645 = vmatprep.subr.mxu1 %v195_v5  ;;  %626 = vmatpush3.msra.mxu0 %v576_v4  ;;  %v189_v17 = vld [vmem:[%s801_s0 + $0x20] sm:$0xff]  ;;  %v191_v21 = vld [vmem:[%s801_s0 + $0x30] sm:$0xff]  ;;  %v192_v23 = vld [vmem:[%s801_s0 + $0x38] sm:$0xff] }
  0x13   : > { %646 = vmatpush3.msra.mxu1 %v195_v5  ;;  %627 = vmatprep.subr.mxu0 %v575_v6  ;;  %v594_v26 = vld [vmem:[%s179_s28] ss:$0 sm:$0xff] }
  0x14   : > { %647 = vmatprep.subr.mxu1 %v194_v7  ;;  %628 = vmatpush3.msra.mxu0 %v575_v6 }
  0x15   : > { %648 = vmatpush3.msra.mxu1 %v194_v7  ;;  %629 = vmatprep.subr.mxu0 %v574_v8 }
  0x16   : > { %649 = vmatprep.subr.mxu1 %v193_v9  ;;  %630 = vmatpush3.msra.mxu0 %v574_v8 }
  0x17   : > { %650 = vmatpush3.msra.mxu1 %v193_v9  ;;  %632 = vmatmul.mubr.msk.f32.vlgmr.msra.gmra.mxu0 %vm211_vm0, %v567_v10 }
  0x18   : > { %652 = vmatmul.mubr.msk.f32.vlgmr.msra.gmra.mxu1 %vm211_vm0, %v186_v11  ;;  %634 = vmatprep.mubr.msk.f32.mxu0 %vm211_vm0, %v568_v12 }
  0x19   : > { %654 = vmatprep.mubr.msk.f32.mxu1 %vm211_vm0, %v187_v13 }
  0x1b   : > { %635 = vmatmul.mubr.msk.f32.gmra.mxu0 %vm211_vm0, %v569_v14 }
  0x1c   : > { %655 = vmatmul.mubr.msk.f32.gmra.mxu1 %vm211_vm0, %v188_v15  ;;  %637 = vmatprep.mubr.msk.f32.mxu0 %vm211_vm0, %v570_v16 }
  0x1d   : > { %657 = vmatprep.mubr.msk.f32.mxu1 %vm211_vm0, %v189_v17 }
  0x1f   : > { %638 = vmatmul.mubr.msk.f32.gmra.mxu0 %vm211_vm0, %v571_v18 }
  0x20   : > { %658 = vmatmul.mubr.msk.f32.gmra.mxu1 %vm211_vm0, %v190_v19  ;;  %640 = vmatprep.mubr.msk.f32.mxu0 %vm211_vm0, %v572_v20 }
  0x21   : > { %660 = vmatprep.mubr.msk.f32.mxu1 %vm211_vm0, %v191_v21 }
  0x23   : > { %641 = vmatmul.mubr.msk.f32.gmra.mxu0 %vm211_vm0, %v573_v22 }
  0x24   : > { %661 = vmatmul.mubr.msk.f32.gmra.mxu1 %vm211_vm0, %v192_v23 }
  0xd7   : > { %v633_v24 = vpop.f32.mrf.mxu0 }
  0xd8   : > { %v653_v25 = vpop.f32.mrf.mxu1 }
  0xd9   : > { %v437_v27 = vadd.f32 %v653_v25, %v633_v24  ;;  %v302_v28 = vpop.f32.mrf.mxu0 }
  0xda   : > { %v431_v29 = vpop.f32.mrf.mxu1 }
  0xdb   : > { %v478_v30 = vadd.f32 %v594_v26, %v437_v27  ;;  %v432_v31 = vadd.f32 %v431_v29, %v302_v28  ;;  %v636_v32 = vpop.f32.mrf.mxu0 }
  0xdc   : > { %v656_v33 = vpop.f32.mrf.mxu1 }
  0xdd   : > { %486 = vst [vmem:[%s788_s4 + $0x8] sm:$0xff] %v478_v30  ;;  %v477_v34 = vadd.f32 %v594_v26, %v432_v31  ;;  %v447_v35 = vadd.f32 %v656_v33, %v636_v32  ;;  %v312_v36 = vpop.f32.mrf.mxu0 }
  0xde   : > { %v441_v37 = vpop.f32.mrf.mxu1 }
  0xdf   : > { %485 = vst [vmem:[%s788_s4] sm:$0xff] %v477_v34  ;;  %v480_v38 = vadd.f32 %v594_v26, %v447_v35  ;;  %v442_v39 = vadd.f32 %v441_v37, %v312_v36  ;;  %v639_v40 = vpop.f32.mrf.mxu0 }
  0xe0   : > { %v659_v41 = vpop.f32.mrf.mxu1 }
  0xe1   : > { %488 = vst [vmem:[%s788_s4 + $0x18] sm:$0xff] %v480_v38  ;;  %v479_v42 = vadd.f32 %v594_v26, %v442_v39  ;;  %v457_v43 = vadd.f32 %v659_v41, %v639_v40  ;;  %v322_v44 = vpop.f32.mrf.mxu0 }
  0xe2   : > { %v451_v45 = vpop.f32.mrf.mxu1 }
  0xe3   : > { %487 = vst [vmem:[%s788_s4 + $0x10] sm:$0xff] %v479_v42  ;;  %v482_v46 = vadd.f32 %v594_v26, %v457_v43  ;;  %v452_v47 = vadd.f32 %v451_v45, %v322_v44  ;;  %v642_v48 = vpop.f32.mrf.mxu0 }
  0xe4   : > { %v662_v49 = vpop.f32.mrf.mxu1 }
  0xe5   : > { %490 = vst [vmem:[%s788_s4 + $0x28] sm:$0xff] %v482_v46  ;;  %v481_v50 = vadd.f32 %v594_v26, %v452_v47  ;;  %v467_v51 = vadd.f32 %v662_v49, %v642_v48  ;;  %v332_v52 = vpop.f32.mrf.mxu0 }
  0xe6   : > { %v461_v53 = vpop.f32.mrf.mxu1 }
  0xe7   : > { %489 = vst [vmem:[%s788_s4 + $0x20] sm:$0xff] %v481_v50  ;;  %v484_v54 = vadd.f32 %v594_v26, %v467_v51  ;;  %v462_v55 = vadd.f32 %v461_v53, %v332_v52 }
  0xe9   : > { %492 = vst [vmem:[%s788_s4 + $0x38] sm:$0xff] %v484_v54  ;;  %v483_v56 = vadd.f32 %v594_v26, %v462_v55 }
  0xeb   : > { %491 = vst [vmem:[%s788_s4 + $0x30] sm:$0xff] %v483_v56 }
  0xec PF: > { %s13_s12 = sadd.s32 1, %s677_s12  }
  0xed   : > { %p10_p4 = scmp.ge.s32.totalorder %s13_s12, 4  }
  0xef   :  { %12 = sbr.rel (!%p10_p4) target bundleno = 1 (0x1), region = 67 }

// kernel: rnn_forward.5
= control target key start
LH: loop header
LB: loop body
LE: loop exit
PB: predicated region body
PF: predicated region fallthrough
CT: control target
= control target key end

     0   :  { %s1716_s9 = smov 0   ;;  %s1718_s10 = smov 0   ;;  %s1996_s0 = inlined_call_operand.vmem [shape: f32[2,8,8,128], index: 0, kind: input, shape index: {}]   ;;  %s1997_s1 = inlined_call_operand.vmem [shape: f32[2,32,128], index: 1, kind: input, shape index: {}]   ;;  %s1998_s2 = inlined_call_operand.vmem [shape: f32[2,8,8,32], index: 2, kind: output, shape index: {}]  }
   0x1   :  { %s1720_s11 = smov 0  }
   0x2 LB: > { %s24_s12 = sadd.s32 1, %s1690_s10  ;;  %p1397_p0 = scmp.ge.s32.totalorder %s1694_s11, 1  ;;  %s1694_s11 = sphi %s1720_s11, %s12_s11   ;;  %s1690_s10 = sphi %s1718_s10, %s2000_s10   ;;  %s1686_s9 = sphi %s1716_s9, %s1999_s9  }
   0x3   : > { %p26_p1 = scmp.ge.s32.totalorder %s24_s12, 2  ;;  %p167_p2 = scmp.lt.s32.totalorder %s1694_s11, 3 }
   0x5   : > { %s2002_s12 = smov (%p26_p1, %s24_s12), 0  ;;  %p168_p3 = pnand %p1397_p0, %p167_p2 }
   0x6   : > { %p215_p4 = scmp.lt.s32.totalorder (!%p168_p3), %s1686_s9, 1  ;;  %s1404_s19 = smul.u32 (!%p168_p3), 56, %s1686_s9 }
   0x7   : > { %171 = sbr.rel (%p168_p3) target bundleno = 5593 (0x15d9), region = 28  ;;  %s1698_s24 = smov (!%p168_p3), 64  }
   0x8   : > { %s1699_s25 = smov (!%p168_p3), 32   ;;  %s1700_s26 = smov (!%p168_p3), 96  }
   0x9   : > { %s1407_s3 = smul.u32 (!%p168_p3), 40, %s1686_s9  ;;  %s745_s16 = ssub.s32 (!%p168_p3), 4, %s1686_s9 }
   0xa   : > { %s1413_s6 = smul.u32 (!%p168_p3), 24, %s1686_s9 }
   0xb   : > { %s1428_s20 = smul.u32 (!%p168_p3), 4294967272, %s1686_s9 }
   0xc   : > { %vm255_vm0 = vcmask 261120   ;;  %v1696_v0 = vmov 0.0   ;;  %vm1697_vm1 = vmmov 0   ;;  %s1745_s13 = scalar_select %p215_p4, %s1686_s9, 1 }
   0xd   : > { %1491 = vmatprep.subr.mxu0 %v1696_v0  ;;  %1499 = vmatprep.mubr.msk.f32.mxu0 %vm1697_vm1, %v1696_v0  ;;  %256 = vst.msk [vmem:[#allocation2] sm:$0xff] %vm255_vm0, %v1696_v0  ;;  %257 = vst.msk [vmem:[#allocation3] sm:$0xff] %vm255_vm0, %v1696_v0  ;;  %s1434_s27 = smul.u32 4294967256, %s1686_s9 }
   0xe   : > { %1502 = vmatprep.subr.mxu1 %v1696_v0  ;;  %1510 = vmatprep.mubr.msk.f32.mxu1 %vm1697_vm1, %v1696_v0  ;;  %s1449_s14 = sshll.u32 %s1745_s13, 5  ;;  %s1448_s18 = sshll.u32 %s1745_s13, 6 }
   0xf   : > { %s232_s17 = scalar_lea.vmem %s1997_s1, %s1449_s14  ;;  %s1796_s22 = scalar_lea.vmem %s1996_s0, %s1448_s18 }
  0x10   : > { %v1754_v1 = vld [vmem:[%s232_s17 + $0x18] sm:$0xff]  ;;  %v1756_v2 = vld [vmem:[%s232_s17 + $0x10] sm:$0xff]  ;;  %v1761_v3 = vld [vmem:[%s232_s17 + $0x8] sm:$0xff]  ;;  %s264_s23 = scalar_lea.vmem %s1796_s22, %s1404_s19  ;;  %s1814_s29 = scalar_lea.vmem %s1998_s2, %s1448_s18 }
  0x11   : > { %1492 = vmatpush3.msra.mxu0 %v1754_v1  ;;  %1503 = vmatpush3.msra.mxu1 %v1754_v1  ;;  %v1767_v4 = vld [vmem:[%s232_s17] sm:$0xff]  ;;  %s381_s30 = scalar_lea.vmem %s1814_s29, %s1404_s19  ;;  %s1302_s4 = scalar_lea.vmem %s1796_s22, %s1407_s3 }
  0x12   : > { %1493 = vmatprep.subr.mxu0 %v1696_v0  ;;  %1504 = vmatprep.subr.mxu1 %v1696_v0  ;;  %v265_v6 = vld [vmem:[%s264_s23] sm:$0xff]  ;;  %v1408_v29 = vld [vmem:[%s1302_s4 + $0x8] sm:$0xff]  ;;  %s1306_s5 = scalar_lea.vmem %s1814_s29, %s1407_s3  ;;  %s1310_s7 = scalar_lea.vmem %s1796_s22, %s1413_s6 }
  0x13   : > { %1494 = vmatpush3.msra.mxu0 %v1756_v2  ;;  %1505 = vmatpush3.msra.mxu1 %v1756_v2  ;;  %v1414_v51 = vld [vmem:[%s1310_s7 + $0x10] sm:$0xff]  ;;  %s1314_s8 = scalar_lea.vmem %s1814_s29, %s1413_s6  ;;  %s1419_s13 = sshll.u32 %s1686_s9, 3 }
  0x14   : > { %1495 = vmatprep.subr.mxu0 %v1696_v0  ;;  %1506 = vmatprep.subr.mxu1 %v1696_v0  ;;  %v266_v5 = vld [vmem:[#allocation2] sm:$0xff]  ;;  %v349_v11 = vld [vmem:[#allocation3] sm:$0xff]  ;;  %s1317_s14 = scalar_lea.vmem %s1796_s22, %s1419_s13  ;;  %s1320_s15 = scalar_lea.vmem %s1814_s29, %s1419_s13 }
  0x15   : > { %1496 = vmatpush3.msra.mxu0 %v1761_v3  ;;  %1507 = vmatpush3.msra.mxu1 %v1761_v3  ;;  %s1913_s17 = sshll.u32 %s745_s16, 3  ;;  %s1328_s21 = scalar_lea.vmem %s1796_s22, %s1428_s20 }
  0x16   : > { %1497 = vmatprep.subr.mxu0 %v1696_v0  ;;  %1508 = vmatprep.subr.mxu1 %v1696_v0  ;;  %s747_s18 = scalar_lea.vmem %s1796_s22, %s1913_s17  ;;  %s863_s19 = scalar_lea.vmem %s1814_s29, %s1913_s17 }
  0x17   : > { %1498 = vmatpush3.msra.mxu0 %v1767_v4  ;;  %1509 = vmatpush3.msra.mxu1 %v1767_v4  ;;  %s1332_s23 = scalar_lea.vmem %s1814_s29, %s1428_s20  ;;  %s1336_s28 = scalar_lea.vmem %s1796_s22, %s1434_s27 }
  0x18   : > { %1500 = vmatmul.mubr.msk.f32.vlgmr.msra.gmra.mxu0 %vm255_vm0, %v266_v5  ;;  %1513 = vmatprep.subr.mxu0 %v1696_v0  ;;  %s1440_s3 = smul.u32 4294967240, %s1686_s9 }
  0x19   : > { %1514 = vmatpush3.msra.mxu0 %v1754_v1  ;;  %1521 = vmatprep.mubr.msk.f32.mxu0 %vm1697_vm1, %v1696_v0 }
  0x1a   : > { %1515 = vmatprep.subr.mxu0 %v1696_v0  ;;  %1524 = vmatprep.subr.mxu1 %v1696_v0  ;;  %s1344_s4 = scalar_lea.vmem %s1796_s22, %s1440_s3  ;;  %s1348_s22 = scalar_lea.vmem %s1814_s29, %s1440_s3 }
  0x1b   : > { %1516 = vmatpush3.msra.mxu0 %v1756_v2 }
  0x1c   : > { %1517 = vmatprep.subr.mxu0 %v1696_v0 }
  0x1d   : > { %1518 = vmatpush3.msra.mxu0 %v1761_v3 }
  0x1e   : > { %1519 = vmatprep.subr.mxu0 %v1696_v0 }
  0x1f   : > { %1520 = vmatpush3.msra.mxu0 %v1767_v4 }
  0x20   : > { %1535 = vmatprep.subr.mxu0 %v1696_v0 }
  0xd8   : > { %v337_v7 = vpop.f32.mrf.mxu0 }
  0xd9   : > { %v341_v8 = vadd.f32 %v337_v7, %v265_v6 }
  0xda   : > { %v1501_v9 = vpop.f32.mrf.mxu0 }
  0xdb   : > { %1608 = vtanh.f32 %v341_v8  ;;  %v1406_v12 = vmul.f32 -1.442695, %v341_v8 }
  0xdd   : > { %1610 = vpow2.f32 %v1406_v12 }
  0xe8   : > { %v1609_v10 = vpop.eup %1608 }
  0xe9   : > { %356 = vrot.lane.b32.xlu0 %v1609_v10, %s1698_s24 }
  0xea   : > { %v1611_v13 = vpop.eup %1610 }
  0xeb   : > { %v345_v14 = vadd.f32 1.0, %v1611_v13 }
  0xed   : > { %351 = vrot.lane.b32.xlu0 %v349_v11, %s1699_s25  ;;  %1612 = vrcp.f32 %v345_v14  ;;  %v1420_v14 = vld [vmem:[%s1317_s14 + $0x18] sm:$0xff] }
  0xfa   : > { %v1613_v15 = vpop.eup %1612 }
 0x15b   : > { %v357_v16 = vpop.permute.xlu0 %356 }
 0x15c   : > { %v359_v17 = vmul.f32 %v1613_v15, %v357_v16 }
 0x15e   : > { %361 = vrot.lane.b32.xlu1 %v359_v17, %s1699_s25 }
 0x15f   : > { %v352_v18 = vpop.permute.xlu0 %351 }
 0x160   : > { %v354_v19 = vmul.f32 %v1613_v15, %v352_v18 }
 0x1d0   : > { %v362_v20 = vpop.permute.xlu1 %361 }
 0x1d1   : > { %v364_v21 = vadd.f32 %v362_v20, %v354_v19 }
 0x1d3   : > { %1614 = vtanh.f32 %v364_v21 }
 0x1e0   : > { %v1615_v22 = vpop.eup %1614 }
 0x1e1   : > { %367 = vrot.lane.b32.xlu1 %v1615_v22, %s1698_s24 }
 0x1e5   : > { %372 = vrot.lane.b32.xlu1 %v364_v21, %s1700_s26 }
 0x253   : > { %v368_v23 = vpop.permute.xlu1 %367 }
 0x254   : > { %v370_v24 = vmul.f32 %v1613_v15, %v368_v23 }
 0x256   : > { %377 = vrot.lane.b32.xlu0 %v370_v24, %s1699_s25 }
 0x257   : > { %v373_v25 = vpop.permute.xlu1 %372 }
 0x258   : > { %375 = vst.msk [vmem:[#allocation3] sm:$0xff] %vm255_vm0, %v373_v25 }
 0x25f   : > { %v470_v26 = vld [vmem:[#allocation3] sm:$0xff] }
 0x260   : > { %472 = vrot.lane.b32.xlu1 %v470_v26, %s1699_s25 }
 0x2c8   : > { %v378_v27 = vpop.permute.xlu0 %377 }
 0x2c9   : > { %380 = vst.msk [vmem:[#allocation2] sm:$0xff] %vm255_vm0, %v378_v27  ;;  %382 = vst.msk [vmem:[%s381_s30] sm:$0xff] %vm255_vm0, %v378_v27  ;;  %s1340_s30 = scalar_lea.vmem %s1814_s29, %s1434_s27 }
 0x2d0   : > { %v388_v28 = vld [vmem:[#allocation2] sm:$0xff] }
 0x2d1   : > { %1511 = vmatmul.mubr.msk.f32.vlgmr.msra.gmra.mxu1 %vm255_vm0, %v388_v28 }
 0x2d2   : > { %1525 = vmatpush3.msra.mxu1 %v1754_v1  ;;  %1532 = vmatprep.mubr.msk.f32.mxu1 %vm1697_vm1, %v1696_v0  ;;  %v473_v40 = vpop.permute.xlu1 %472 }
 0x2d3   : > { %1526 = vmatprep.subr.mxu1 %v1696_v0 }
 0x2d4   : > { %1527 = vmatpush3.msra.mxu1 %v1756_v2 }
 0x2d5   : > { %1528 = vmatprep.subr.mxu1 %v1696_v0 }
 0x2d6   : > { %1529 = vmatpush3.msra.mxu1 %v1761_v3 }
 0x2d7   : > { %1530 = vmatprep.subr.mxu1 %v1696_v0 }
 0x2d8   : > { %1531 = vmatpush3.msra.mxu1 %v1767_v4 }
 0x2d9   : > { %1546 = vmatprep.subr.mxu1 %v1696_v0 }
 0x391   : > { %v458_v30 = vpop.f32.mrf.mxu1 }
 0x392   : > { %v462_v31 = vadd.f32 %v1408_v29, %v458_v30 }
 0x393   : > { %v1512_v32 = vpop.f32.mrf.mxu1 }
 0x394   : > { %1616 = vtanh.f32 %v462_v31  ;;  %v1410_v34 = vmul.f32 -1.442695, %v462_v31 }
 0x396   : > { %1618 = vpow2.f32 %v1410_v34 }
 0x3a1   : > { %v1617_v33 = vpop.eup %1616 }
 0x3a2   : > { %477 = vrot.lane.b32.xlu0 %v1617_v33, %s1698_s24 }
 0x3a3   : > { %v1619_v35 = vpop.eup %1618 }
 0x3a4   : > { %v466_v36 = vadd.f32 1.0, %v1619_v35 }
 0x3a6   : > { %1620 = vrcp.f32 %v466_v36  ;;  %v748_v36 = vld [vmem:[%s747_s18] sm:$0xff] }
 0x3b3   : > { %v1621_v37 = vpop.eup %1620 }
 0x3b4   : > { %v475_v41 = vmul.f32 %v1621_v37, %v473_v40 }
 0x414   : > { %v478_v38 = vpop.permute.xlu0 %477 }
 0x415   : > { %v480_v39 = vmul.f32 %v1621_v37, %v478_v38 }
 0x417   : > { %482 = vrot.lane.b32.xlu0 %v480_v39, %s1699_s25 }
 0x489   : > { %v483_v42 = vpop.permute.xlu0 %482 }
 0x48a   : > { %v485_v43 = vadd.f32 %v483_v42, %v475_v41 }
 0x48c   : > { %1622 = vtanh.f32 %v485_v43 }
 0x499   : > { %v1623_v44 = vpop.eup %1622 }
 0x49a   : > { %488 = vrot.lane.b32.xlu1 %v1623_v44, %s1698_s24 }
 0x49e   : > { %493 = vrot.lane.b32.xlu1 %v485_v43, %s1700_s26 }
 0x50c   : > { %v489_v45 = vpop.permute.xlu1 %488 }
 0x50d   : > { %v491_v46 = vmul.f32 %v1621_v37, %v489_v45 }
 0x50f   : > { %498 = vrot.lane.b32.xlu0 %v491_v46, %s1699_s25 }
 0x510   : > { %v494_v47 = vpop.permute.xlu1 %493 }
 0x511   : > { %496 = vst.msk [vmem:[#allocation3] sm:$0xff] %vm255_vm0, %v494_v47 }
 0x518   : > { %v591_v48 = vld [vmem:[#allocation3] sm:$0xff] }
 0x519   : > { %593 = vrot.lane.b32.xlu1 %v591_v48, %s1699_s25 }
 0x581   : > { %v499_v49 = vpop.permute.xlu0 %498 }
 0x582   : > { %501 = vst.msk [vmem:[#allocation2] sm:$0xff] %vm255_vm0, %v499_v49  ;;  %1412 = vst.msk [vmem:[%s1306_s5 + $0x8] sm:$0xff] %vm255_vm0, %v499_v49 }
 0x589   : > { %v509_v50 = vld [vmem:[#allocation2] sm:$0xff] }
 0x58a   : > { %1522 = vmatmul.mubr.msk.f32.vlgmr.msra.gmra.mxu0 %vm255_vm0, %v509_v50 }
 0x58b   : > { %1536 = vmatpush3.msra.mxu0 %v1754_v1  ;;  %1543 = vmatprep.mubr.msk.f32.mxu0 %vm1697_vm1, %v1696_v0  ;;  %v594_v62 = vpop.permute.xlu1 %593 }
 0x58c   : > { %1537 = vmatprep.subr.mxu0 %v1696_v0 }
 0x58d   : > { %1538 = vmatpush3.msra.mxu0 %v1756_v2 }
 0x58e   : > { %1539 = vmatprep.subr.mxu0 %v1696_v0 }
 0x58f   : > { %1540 = vmatpush3.msra.mxu0 %v1761_v3 }
 0x590   : > { %1541 = vmatprep.subr.mxu0 %v1696_v0 }
 0x591   : > { %1542 = vmatpush3.msra.mxu0 %v1767_v4 }
 0x592   : > { %1557 = vmatprep.subr.mxu0 %v1696_v0 }
 0x64a   : > { %v579_v52 = vpop.f32.mrf.mxu0 }
 0x64b   : > { %v583_v53 = vadd.f32 %v1414_v51, %v579_v52 }
 0x64c   : > { %v1523_v54 = vpop.f32.mrf.mxu0 }
 0x64d   : > { %1624 = vtanh.f32 %v583_v53  ;;  %v1416_v56 = vmul.f32 -1.442695, %v583_v53 }
 0x64f   : > { %1626 = vpow2.f32 %v1416_v56 }
 0x65a   : > { %v1625_v55 = vpop.eup %1624 }
 0x65b   : > { %598 = vrot.lane.b32.xlu0 %v1625_v55, %s1698_s24 }
 0x65c   : > { %v1627_v57 = vpop.eup %1626 }
 0x65d   : > { %v587_v58 = vadd.f32 1.0, %v1627_v57 }
 0x65f   : > { %1628 = vrcp.f32 %v587_v58  ;;  %v1429_v58 = vld [vmem:[%s1328_s21 + $0x28] sm:$0xff] }
 0x66c   : > { %v1629_v59 = vpop.eup %1628 }
 0x66d   : > { %v596_v63 = vmul.f32 %v1629_v59, %v594_v62 }
 0x6cd   : > { %v599_v60 = vpop.permute.xlu0 %598 }
 0x6ce   : > { %v601_v61 = vmul.f32 %v1629_v59, %v599_v60 }
 0x6d0   : > { %603 = vrot.lane.b32.xlu0 %v601_v61, %s1699_s25 }
 0x742   : > { %v604_v5 = vpop.permute.xlu0 %603 }
 0x743   : > { %v606_v6 = vadd.f32 %v604_v5, %v596_v63 }
 0x745   : > { %1630 = vtanh.f32 %v606_v6 }
 0x752   : > { %v1631_v7 = vpop.eup %1630 }
 0x753   : > { %609 = vrot.lane.b32.xlu1 %v1631_v7, %s1698_s24 }
 0x757   : > { %614 = vrot.lane.b32.xlu1 %v606_v6, %s1700_s26 }
 0x7c5   : > { %v610_v8 = vpop.permute.xlu1 %609 }
 0x7c6   : > { %v612_v9 = vmul.f32 %v1629_v59, %v610_v8 }
 0x7c8   : > { %619 = vrot.lane.b32.xlu0 %v612_v9, %s1699_s25 }
 0x7c9   : > { %v615_v10 = vpop.permute.xlu1 %614 }
 0x7ca   : > { %617 = vst.msk [vmem:[#allocation3] sm:$0xff] %vm255_vm0, %v615_v10 }
 0x7d1   : > { %v711_v11 = vld [vmem:[#allocation3] sm:$0xff] }
 0x7d2   : > { %713 = vrot.lane.b32.xlu1 %v711_v11, %s1699_s25 }
 0x83a   : > { %v620_v12 = vpop.permute.xlu0 %619 }
 0x83b   : > { %622 = vst.msk [vmem:[#allocation2] sm:$0xff] %vm255_vm0, %v620_v12  ;;  %1418 = vst.msk [vmem:[%s1314_s8 + $0x10] sm:$0xff] %vm255_vm0, %v620_v12 }
 0x842   : > { %v629_v13 = vld [vmem:[#allocation2] sm:$0xff] }
 0x843   : > { %1533 = vmatmul.mubr.msk.f32.vlgmr.msra.gmra.mxu1 %vm255_vm0, %v629_v13 }
 0x844   : > { %1547 = vmatpush3.msra.mxu1 %v1754_v1  ;;  %1554 = vmatprep.mubr.msk.f32.mxu1 %vm1697_vm1, %v1696_v0  ;;  %v714_v25 = vpop.permute.xlu1 %713 }
 0x845   : > { %1548 = vmatprep.subr.mxu1 %v1696_v0 }
 0x846   : > { %1549 = vmatpush3.msra.mxu1 %v1756_v2 }
 0x847   : > { %1550 = vmatprep.subr.mxu1 %v1696_v0 }
 0x848   : > { %1551 = vmatpush3.msra.mxu1 %v1761_v3 }
 0x849   : > { %1552 = vmatprep.subr.mxu1 %v1696_v0 }
 0x84a   : > { %1553 = vmatpush3.msra.mxu1 %v1767_v4 }
 0x84b   : > { %1568 = vmatprep.subr.mxu1 %v1696_v0 }
 0x903   : > { %v699_v15 = vpop.f32.mrf.mxu1 }
 0x904   : > { %v703_v16 = vadd.f32 %v1420_v14, %v699_v15 }
 0x905   : > { %v1534_v17 = vpop.f32.mrf.mxu1 }
 0x906   : > { %1632 = vtanh.f32 %v703_v16  ;;  %v1422_v19 = vmul.f32 -1.442695, %v703_v16  ;;  %v1435_v16 = vld [vmem:[%s1336_s28 + $0x30] sm:$0xff] }
 0x908   : > { %1634 = vpow2.f32 %v1422_v19 }
 0x913   : > { %v1633_v18 = vpop.eup %1632 }
 0x914   : > { %718 = vrot.lane.b32.xlu0 %v1633_v18, %s1698_s24 }
 0x915   : > { %v1635_v20 = vpop.eup %1634 }
 0x916   : > { %v707_v21 = vadd.f32 1.0, %v1635_v20 }
 0x918   : > { %1636 = vrcp.f32 %v707_v21 }
 0x925   : > { %v1637_v22 = vpop.eup %1636 }
 0x926   : > { %v716_v26 = vmul.f32 %v1637_v22, %v714_v25 }
 0x986   : > { %v719_v23 = vpop.permute.xlu0 %718 }
 0x987   : > { %v721_v24 = vmul.f32 %v1637_v22, %v719_v23 }
 0x989   : > { %723 = vrot.lane.b32.xlu0 %v721_v24, %s1699_s25 }
 0x9fb   : > { %v724_v27 = vpop.permute.xlu0 %723 }
 0x9fc   : > { %v726_v28 = vadd.f32 %v724_v27, %v716_v26 }
 0x9fe   : > { %1638 = vtanh.f32 %v726_v28 }
 0xa0b   : > { %v1639_v29 = vpop.eup %1638 }
 0xa0c   : > { %729 = vrot.lane.b32.xlu1 %v1639_v29, %s1698_s24 }
 0xa10   : > { %734 = vrot.lane.b32.xlu1 %v726_v28, %s1700_s26 }
 0xa7e   : > { %v730_v30 = vpop.permute.xlu1 %729 }
 0xa7f   : > { %v732_v31 = vmul.f32 %v1637_v22, %v730_v30 }
 0xa81   : > { %739 = vrot.lane.b32.xlu0 %v732_v31, %s1699_s25 }
 0xa82   : > { %v735_v32 = vpop.permute.xlu1 %734 }
 0xa83   : > { %737 = vst.msk [vmem:[#allocation3] sm:$0xff] %vm255_vm0, %v735_v32 }
 0xa8a   : > { %v831_v33 = vld [vmem:[#allocation3] sm:$0xff] }
 0xa8b   : > { %833 = vrot.lane.b32.xlu1 %v831_v33, %s1699_s25 }
 0xaf3   : > { %v740_v34 = vpop.permute.xlu0 %739 }
 0xaf4   : > { %742 = vst.msk [vmem:[#allocation2] sm:$0xff] %vm255_vm0, %v740_v34  ;;  %1424 = vst.msk [vmem:[%s1320_s15 + $0x18] sm:$0xff] %vm255_vm0, %v740_v34 }
 0xafb   : > { %v749_v35 = vld [vmem:[#allocation2] sm:$0xff] }
 0xafc   : > { %1544 = vmatmul.mubr.msk.f32.vlgmr.msra.gmra.mxu0 %vm255_vm0, %v749_v35 }
 0xafd   : > { %1558 = vmatpush3.msra.mxu0 %v1754_v1  ;;  %1565 = vmatprep.mubr.msk.f32.mxu0 %vm1697_vm1, %v1696_v0  ;;  %v834_v47 = vpop.permute.xlu1 %833 }
 0xafe   : > { %1559 = vmatprep.subr.mxu0 %v1696_v0 }
 0xaff   : > { %1560 = vmatpush3.msra.mxu0 %v1756_v2 }
 0xb00   : > { %1561 = vmatprep.subr.mxu0 %v1696_v0 }
 0xb01   : > { %1562 = vmatpush3.msra.mxu0 %v1761_v3 }
 0xb02   : > { %1563 = vmatprep.subr.mxu0 %v1696_v0 }
 0xb03   : > { %1564 = vmatpush3.msra.mxu0 %v1767_v4 }
 0xbbc   : > { %v819_v37 = vpop.f32.mrf.mxu0 }
 0xbbd   : > { %v823_v38 = vadd.f32 %v819_v37, %v748_v36 }
 0xbbe   : > { %v1545_v39 = vpop.f32.mrf.mxu0 }
 0xbbf   : > { %1640 = vtanh.f32 %v823_v38  ;;  %v1427_v41 = vmul.f32 -1.442695, %v823_v38  ;;  %v1441_v38 = vld [vmem:[%s1344_s4 + $0x38] sm:$0xff] }
 0xbc1   : > { %1642 = vpow2.f32 %v1427_v41 }
 0xbcc   : > { %v1641_v40 = vpop.eup %1640 }
 0xbcd   : > { %838 = vrot.lane.b32.xlu0 %v1641_v40, %s1698_s24 }
 0xbce   : > { %v1643_v42 = vpop.eup %1642 }
 0xbcf   : > { %v827_v43 = vadd.f32 1.0, %v1643_v42 }
 0xbd1   : > { %1644 = vrcp.f32 %v827_v43 }
 0xbde   : > { %v1645_v44 = vpop.eup %1644 }
 0xbdf   : > { %v836_v48 = vmul.f32 %v1645_v44, %v834_v47 }
 0xc3f   : > { %v839_v45 = vpop.permute.xlu0 %838 }
 0xc40   : > { %v841_v46 = vmul.f32 %v1645_v44, %v839_v45 }
 0xc42   : > { %843 = vrot.lane.b32.xlu0 %v841_v46, %s1699_s25 }
 0xcb4   : > { %v844_v49 = vpop.permute.xlu0 %843 }
 0xcb5   : > { %v846_v50 = vadd.f32 %v844_v49, %v836_v48 }
 0xcb7   : > { %1646 = vtanh.f32 %v846_v50 }
 0xcc4   : > { %v1647_v51 = vpop.eup %1646 }
 0xcc5   : > { %849 = vrot.lane.b32.xlu1 %v1647_v51, %s1698_s24 }
 0xcc9   : > { %854 = vrot.lane.b32.xlu1 %v846_v50, %s1700_s26 }
 0xd37   : > { %v850_v52 = vpop.permute.xlu1 %849 }
 0xd38   : > { %v852_v53 = vmul.f32 %v1645_v44, %v850_v52 }
 0xd3a   : > { %859 = vrot.lane.b32.xlu0 %v852_v53, %s1699_s25 }
 0xd3b   : > { %v855_v54 = vpop.permute.xlu1 %854 }
 0xd3c   : > { %857 = vst.msk [vmem:[#allocation3] sm:$0xff] %vm255_vm0, %v855_v54 }
 0xd43   : > { %v952_v55 = vld [vmem:[#allocation3] sm:$0xff] }
 0xd44   : > { %954 = vrot.lane.b32.xlu1 %v952_v55, %s1699_s25 }
 0xdac   : > { %v860_v56 = vpop.permute.xlu0 %859 }
 0xdad   : > { %862 = vst.msk [vmem:[#allocation2] sm:$0xff] %vm255_vm0, %v860_v56  ;;  %864 = vst.msk [vmem:[%s863_s19] sm:$0xff] %vm255_vm0, %v860_v56 }
 0xdb4   : > { %v870_v57 = vld [vmem:[#allocation2] sm:$0xff] }
 0xdb5   : > { %1555 = vmatmul.mubr.msk.f32.vlgmr.msra.gmra.mxu1 %vm255_vm0, %v870_v57 }
 0xdb6   : > { %1569 = vmatpush3.msra.mxu1 %v1754_v1  ;;  %1576 = vmatprep.mubr.msk.f32.mxu1 %vm1697_vm1, %v1696_v0 }
 0xdb7   : > { %1570 = vmatprep.subr.mxu1 %v1696_v0 }
 0xdb8   : > { %1571 = vmatpush3.msra.mxu1 %v1756_v2 }
 0xdb9   : > { %1572 = vmatprep.subr.mxu1 %v1696_v0 }
 0xdba   : > { %1573 = vmatpush3.msra.mxu1 %v1761_v3 }
 0xdbb   : > { %1574 = vmatprep.subr.mxu1 %v1696_v0 }
 0xdbc   : > { %1575 = vmatpush3.msra.mxu1 %v1767_v4  ;;  %v955_v4 = vpop.permute.xlu1 %954 }
 0xe75   : > { %v940_v1 = vpop.f32.mrf.mxu1 }
 0xe76   : > { %v944_v59 = vadd.f32 %v1429_v58, %v940_v1 }
 0xe77   : > { %v1556_v60 = vpop.f32.mrf.mxu1 }
 0xe78   : > { %1648 = vtanh.f32 %v944_v59  ;;  %v1431_v2 = vmul.f32 -1.442695, %v944_v59 }
 0xe7a   : > { %1650 = vpow2.f32 %v1431_v2 }
 0xe85   : > { %v1649_v61 = vpop.eup %1648 }
 0xe86   : > { %959 = vrot.lane.b32.xlu0 %v1649_v61, %s1698_s24 }
 0xe87   : > { %v1651_v62 = vpop.eup %1650 }
 0xe88   : > { %v948_v63 = vadd.f32 1.0, %v1651_v62 }
 0xe8a   : > { %1652 = vrcp.f32 %v948_v63 }
 0xe97   : > { %v1653_v3 = vpop.eup %1652 }
 0xe98   : > { %v957_v6 = vmul.f32 %v1653_v3, %v955_v4 }
 0xef8   : > { %v960_v0 = vpop.permute.xlu0 %959 }
 0xef9   : > { %v962_v5 = vmul.f32 %v1653_v3, %v960_v0 }
 0xefb   : > { %964 = vrot.lane.b32.xlu0 %v962_v5, %s1699_s25 }
 0xf6d   : > { %v965_v7 = vpop.permute.xlu0 %964 }
 0xf6e   : > { %v967_v8 = vadd.f32 %v965_v7, %v957_v6 }
 0xf70   : > { %1654 = vtanh.f32 %v967_v8 }
 0xf7d   : > { %v1655_v9 = vpop.eup %1654 }
 0xf7e   : > { %970 = vrot.lane.b32.xlu1 %v1655_v9, %s1698_s24 }
 0xf82   : > { %975 = vrot.lane.b32.xlu1 %v967_v8, %s1700_s26 }
 0xff0   : > { %v971_v10 = vpop.permute.xlu1 %970 }
 0xff1   : > { %v973_v11 = vmul.f32 %v1653_v3, %v971_v10 }
 0xff3   : > { %980 = vrot.lane.b32.xlu0 %v973_v11, %s1699_s25 }
 0xff4   : > { %v976_v12 = vpop.permute.xlu1 %975 }
 0xff5   : > { %978 = vst.msk [vmem:[#allocation3] sm:$0xff] %vm255_vm0, %v976_v12 }
 0xffc   : > { %v1073_v13 = vld [vmem:[#allocation3] sm:$0xff] }
 0xffd   : > { %1075 = vrot.lane.b32.xlu1 %v1073_v13, %s1699_s25 }
0x1065   : > { %v981_v14 = vpop.permute.xlu0 %980 }
0x1066   : > { %983 = vst.msk [vmem:[#allocation2] sm:$0xff] %vm255_vm0, %v981_v14  ;;  %1433 = vst.msk [vmem:[%s1332_s23 + $0x28] sm:$0xff] %vm255_vm0, %v981_v14 }
0x106d   : > { %v991_v15 = vld [vmem:[#allocation2] sm:$0xff] }
0x106e   : > { %1566 = vmatmul.mubr.msk.f32.vlgmr.msra.gmra.mxu0 %vm255_vm0, %v991_v15 }
0x106f   : > { %v1076_v27 = vpop.permute.xlu1 %1075 }
0x112e   : > { %v1061_v17 = vpop.f32.mrf.mxu0 }
0x112f   : > { %v1065_v18 = vadd.f32 %v1435_v16, %v1061_v17 }
0x1130   : > { %v1567_v19 = vpop.f32.mrf.mxu0 }
0x1131   : > { %1656 = vtanh.f32 %v1065_v18  ;;  %v1437_v21 = vmul.f32 -1.442695, %v1065_v18 }
0x1133   : > { %1658 = vpow2.f32 %v1437_v21 }
0x113e   : > { %v1657_v20 = vpop.eup %1656 }
0x113f   : > { %1080 = vrot.lane.b32.xlu0 %v1657_v20, %s1698_s24 }
0x1140   : > { %v1659_v22 = vpop.eup %1658 }
0x1141   : > { %v1069_v23 = vadd.f32 1.0, %v1659_v22 }
0x1143   : > { %1660 = vrcp.f32 %v1069_v23 }
0x1150   : > { %v1661_v24 = vpop.eup %1660 }
0x1151   : > { %v1078_v28 = vmul.f32 %v1661_v24, %v1076_v27 }
0x11b1   : > { %v1081_v25 = vpop.permute.xlu0 %1080 }
0x11b2   : > { %v1083_v26 = vmul.f32 %v1661_v24, %v1081_v25 }
0x11b4   : > { %1085 = vrot.lane.b32.xlu0 %v1083_v26, %s1699_s25 }
0x1226   : > { %v1086_v29 = vpop.permute.xlu0 %1085 }
0x1227   : > { %v1088_v30 = vadd.f32 %v1086_v29, %v1078_v28 }
0x1229   : > { %1662 = vtanh.f32 %v1088_v30 }
0x1236   : > { %v1663_v31 = vpop.eup %1662 }
0x1237   : > { %1091 = vrot.lane.b32.xlu1 %v1663_v31, %s1698_s24 }
0x123b   : > { %1096 = vrot.lane.b32.xlu1 %v1088_v30, %s1700_s26 }
0x12a9   : > { %v1092_v32 = vpop.permute.xlu1 %1091 }
0x12aa   : > { %v1094_v33 = vmul.f32 %v1661_v24, %v1092_v32 }
0x12ac   : > { %1101 = vrot.lane.b32.xlu0 %v1094_v33, %s1699_s25 }
0x12ad   : > { %v1097_v34 = vpop.permute.xlu1 %1096 }
0x12ae   : > { %1099 = vst.msk [vmem:[#allocation3] sm:$0xff] %vm255_vm0, %v1097_v34 }
0x12b5   : > { %v1194_v35 = vld [vmem:[#allocation3] sm:$0xff] }
0x12b6   : > { %1196 = vrot.lane.b32.xlu1 %v1194_v35, %s1699_s25 }
0x131e   : > { %v1102_v36 = vpop.permute.xlu0 %1101 }
0x131f   : > { %1104 = vst.msk [vmem:[#allocation2] sm:$0xff] %vm255_vm0, %v1102_v36  ;;  %1439 = vst.msk [vmem:[%s1340_s30 + $0x30] sm:$0xff] %vm255_vm0, %v1102_v36 }
0x1326   : > { %v1112_v37 = vld [vmem:[#allocation2] sm:$0xff] }
0x1327   : > { %1577 = vmatmul.mubr.msk.f32.vlgmr.msra.gmra.mxu1 %vm255_vm0, %v1112_v37 }
0x1328   : > { %v1197_v49 = vpop.permute.xlu1 %1196 }
0x13e7   : > { %v1182_v39 = vpop.f32.mrf.mxu1 }
0x13e8   : > { %v1186_v40 = vadd.f32 %v1441_v38, %v1182_v39 }
0x13e9   : > { %v1578_v41 = vpop.f32.mrf.mxu1 }
0x13ea   : > { %1664 = vtanh.f32 %v1186_v40  ;;  %v1443_v43 = vmul.f32 -1.442695, %v1186_v40 }
0x13ec   : > { %1666 = vpow2.f32 %v1443_v43 }
0x13f7   : > { %v1665_v42 = vpop.eup %1664 }
0x13f8   : > { %1201 = vrot.lane.b32.xlu0 %v1665_v42, %s1698_s24 }
0x13f9   : > { %v1667_v44 = vpop.eup %1666 }
0x13fa   : > { %v1190_v45 = vadd.f32 1.0, %v1667_v44 }
0x13fc   : > { %1668 = vrcp.f32 %v1190_v45 }
0x1409   : > { %v1669_v46 = vpop.eup %1668 }
0x140a   : > { %v1199_v50 = vmul.f32 %v1669_v46, %v1197_v49 }
0x146a   : > { %v1202_v47 = vpop.permute.xlu0 %1201 }
0x146b   : > { %v1204_v48 = vmul.f32 %v1669_v46, %v1202_v47 }
0x146d   : > { %1206 = vrot.lane.b32.xlu0 %v1204_v48, %s1699_s25 }
0x14df   : > { %v1207_v51 = vpop.permute.xlu0 %1206 }
0x14e0   : > { %v1209_v52 = vadd.f32 %v1207_v51, %v1199_v50 }
0x14e2   : > { %1670 = vtanh.f32 %v1209_v52  ;;  %1217 = vrot.lane.b32.xlu0 %v1209_v52, %s1700_s26 }
0x14ef   : > { %v1671_v53 = vpop.eup %1670 }
0x14f0   : > { %1212 = vrot.lane.b32.xlu1 %v1671_v53, %s1698_s24 }
0x1554   : > { %v1218_v54 = vpop.permute.xlu0 %1217 }
0x1555   : > { %1220 = vst.msk [vmem:[#allocation3] sm:$0xff] %vm255_vm0, %v1218_v54 }
0x1562   : > { %v1213_v55 = vpop.permute.xlu1 %1212 }
0x1563   : > { %v1215_v56 = vmul.f32 %v1669_v46, %v1213_v55 }
0x1565   : > { %1222 = vrot.lane.b32.xlu1 %v1215_v56, %s1699_s25 }
0x15d7   : > { %v1223_v57 = vpop.permute.xlu1 %1222 }
0x15d8   : > { %1225 = vst.msk [vmem:[#allocation2] sm:$0xff] %vm255_vm0, %v1223_v57  ;;  %1445 = vst.msk [vmem:[%s1348_s22 + $0x38] sm:$0xff] %vm255_vm0, %v1223_v57 }
0x15d9 PF: > { %s12_s11 = sadd.s32 1, %s1694_s11   ;;  %s1999_s9 = smov %s1690_s10 }
0x15da   : > { %p9_p5 = scmp.ge.s32.totalorder %s12_s11, 4   ;;  %s2000_s10 = smov %s2002_s12 }
0x15dc   :  { %11 = sbr.rel (!%p9_p5) target bundleno = 2 (0x2), region = 81 }

</bundles_post_ra>
